<compile_context>
chip_gen: v6e
topology: v6e:2x2x1
jax: 0.10.0
libtpu: 0.0.40
codegen_flags: <defaults>
</compile_context>

<pallas_src>
import numpy as np
import jax
import jax.numpy as jnp
from jax.experimental import pallas as pl
from jax.experimental.pallas import tpu as pltpu


_TAPS = tuple((dy, dx) for dy in (-1, 0, 1) for dx in (-1, 0, 1))


def _round_up(x, m):
    return (x + m - 1) // m * m


def _make_pool_matrix(h, w):
    """(H*W, H*W/4) matrix P with P[y*w+x, (y//2)*(w//2)+(x//2)] = 0.25."""
    hw = h * w
    p = np.zeros((hw, (h // 2) * (w // 2)), np.float32)
    for y in range(h):
        for x in range(w):
            p[y * w + x, (y // 2) * (w // 2) + (x // 2)] = 0.25
    return jnp.asarray(p)


def _make_col_masks(h, w):
    """(2, H*W) {0,1} masks: row 0 valid when col>=1 (dx=-1 taps),
    row 1 valid when col<=w-2 (dx=+1 taps)."""
    col = np.tile(np.arange(w), h)
    m = np.stack([(col >= 1), (col <= w - 2)]).astype(np.float32)
    return jnp.asarray(m)


# ------------------------------ fused kernel ------------------------------
def _make_encoder_kernel(layer_dims):
    """layer_dims: list of (H, W, Cin, Cout, center) per ConvBlock."""
    num_layers = len(layer_dims)

    def kernel(*refs):
        x_ref = refs[0]
        per_layer = refs[1:1 + 4 * num_layers]
        n_in = 1 + 4 * num_layers
        stack_refs = refs[n_in:n_in + num_layers]
        final_ref = refs[n_in + num_layers]
        sc_ref = refs[n_in + num_layers + 1]          # shared halo-row scratch

        cur = x_ref[0].astype(jnp.float32)            # (Cin, H*W), lane-dense

        for li, (h, w, cin, cout, center) in enumerate(layer_dims):
            hw = h * w
            halo = w + 1                              # max |tap lane offset|
            w1_ref = per_layer[4 * li + 0]            # (9, cout, cin)
            w2_ref = per_layer[4 * li + 1]            # (9, cout, cout)
            pool_ref = per_layer[4 * li + 2]          # (hw, hw // 4)
            mask_ref = per_layer[4 * li + 3]          # (2, hw) {0,1}

            mask_l = mask_ref[0:1, :]                 # valid when col >= 1
            mask_r = mask_ref[1:2, :]                 # valid when col <= w-2

            # Zero the vertical-halo borders once per layer (two tiny strips).
            cmax = max(cin, cout)
            sc_ref[0:cmax, center - halo:center] = (
                jnp.zeros((cmax, halo), jnp.float32))
            sc_ref[0:cmax, center + hw:center + hw + halo] = (
                jnp.zeros((cmax, halo), jnp.float32))

            def conv3x3(x_val, w_ref, ci, co):
                # Stage the activation once at a 128-aligned lane offset
                # (dense store); each of the 9 taps is a lane-offset load,
                # masked on the VPU, feeding an accumulating MXU matmul with
                # N = H*W (lane-dense result).
                sc_ref[0:ci, center:center + hw] = x_val
                acc = None
                for t, (dy, dx) in enumerate(_TAPS):
                    start = center + dy * w + dx
                    tap = sc_ref[0:ci, start:start + hw]        # (ci, hw)
                    if dx < 0:
                        tap = tap * mask_l
                    elif dx > 0:
                        tap = tap * mask_r
                    part = jnp.dot(w_ref[t], tap,               # (co, hw)
                                   preferred_element_type=jnp.float32)
                    acc = part if acc is None else acc + part
                return acc

            def inorm_lrelu(y):
                # InstanceNorm2d (affine=False, eps=1e-5, biased var), fused
                # single sweep, then LeakyReLU(0.2).  Per-channel over lanes.
                inv_n = 1.0 / y.shape[-1]
                s = jnp.sum(y, axis=-1, keepdims=True)
                ss = jnp.sum(y * y, axis=-1, keepdims=True)
                m = s * inv_n
                v = jnp.maximum(ss * inv_n - m * m, 0.0)
                y = (y - m) * jax.lax.rsqrt(v + 1e-5)
                return jnp.where(y >= 0, y, 0.2 * y)

            a = inorm_lrelu(conv3x3(cur, w1_ref, cin, cout))
            # nn.Dropout2d: identity (eval mode / drop_prob effect).
            o = inorm_lrelu(conv3x3(a, w2_ref, cout, cout))
            # nn.Dropout2d: identity (eval mode / drop_prob effect).

            stack_refs[li][0] = o.astype(stack_refs[li].dtype)  # lane-dense
            # 2x2 / stride-2 average pool as one MXU matmul (stays lane-dense).
            cur = jnp.dot(o, pool_ref[...], preferred_element_type=jnp.float32)

        final_ref[0] = cur.astype(final_ref.dtype)

    return kernel


# -------------------------------- wrapper ---------------------------------
def encoder_forward(x_nchw, params):
    """Mirrors Encoder.forward: returns (stack, output), both NCHW."""
    N, Cin, H, W = x_nchw.shape
    num_layers = len(params)
    assert H % (2 ** num_layers) == 0 and W % (2 ** num_layers) == 0, \
        "even spatial dims required by the 2x2/2 avg-pool implementation"

    # Channel-major lane-dense input: metadata-only reshape, no transpose.
    x_flat = x_nchw.reshape(N, Cin, H * W).astype(jnp.float32)

    in_specs = [pl.BlockSpec((1, Cin, H * W), lambda n: (n, 0, 0))]
    flat_inputs = [x_flat]
    out_shapes, out_specs = [], []
    layer_dims, spatial = [], []

    h, w, ci = H, W, Cin
    max_rows, max_cols = 1, 1
    for (w1, w2) in params:
        co = w1.shape[1]
        hw = h * w
        halo = w + 1
        center = _round_up(halo, 128)        # 128-aligned staging offset
        layer_dims.append((h, w, ci, co, center))
        spatial.append((h, w))

        pool_mat = _make_pool_matrix(h, w)
        masks = _make_col_masks(h, w)

        in_specs += [
            pl.BlockSpec(w1.shape, lambda n: (0, 0, 0)),
            pl.BlockSpec(w2.shape, lambda n: (0, 0, 0)),
            pl.BlockSpec(pool_mat.shape, lambda n: (0, 0)),
            pl.BlockSpec(masks.shape, lambda n: (0, 0)),
        ]
        flat_inputs += [w1, w2, pool_mat, masks]

        out_shapes.append(jax.ShapeDtypeStruct((N, co, hw), jnp.float32))
        out_specs.append(pl.BlockSpec((1, co, hw), lambda n: (n, 0, 0)))

        max_rows = max(max_rows, ci, co)
        max_cols = max(max_cols, center + hw + halo)
        h, w, ci = h // 2, w // 2, co

    # Final pooled output (lane-dense).
    out_shapes.append(jax.ShapeDtypeStruct((N, ci, h * w), jnp.float32))
    out_specs.append(pl.BlockSpec((1, ci, h * w), lambda n: (n, 0, 0)))

    grid_spec = pltpu.PrefetchScalarGridSpec(
        num_scalar_prefetch=0,
        grid=(N,),                        # keep N even on v7x (2 TensorCores)
        in_specs=in_specs,
        out_specs=out_specs,
        scratch_shapes=[pltpu.VMEM((max_rows, max_cols), jnp.float32)],
    )

    outs = pl.pallas_call(
        _make_encoder_kernel(layer_dims),
        out_shape=tuple(out_shapes),
        grid_spec=grid_spec,
        # Total VMEM footprint is tiny (<1 MiB): rely on the per-generation
        # default scoped-VMEM limit instead of hard-coding a value.
        compiler_params=pltpu.CompilerParams(
            dimension_semantics=("parallel",),
        ),
    )(*flat_inputs)

    stack = [
        outs[li].reshape(N, layer_dims[li][3], spatial[li][0], spatial[li][1])
        for li in range(num_layers)
    ]
    output = outs[num_layers].reshape(N, ci, h, w)
    return stack, output


def init_encoder_params(key, num_pool_layers, in_chans, chans):
    """Weights stored tap-major as (9, Cout, Cin): tap t = (dy+1)*3 + (dx+1),
    i.e. PyTorch (Cout, Cin, 3, 3) permuted to (ky*3+kx, Cout, Cin)."""
    params = []
    ci, co = in_chans, chans
    for _ in range(num_pool_layers):
        key, k1, k2 = jax.random.split(key, 3)
        w1 = jax.random.normal(k1, (9, co, ci), jnp.float32) * 0.1
        w2 = jax.random.normal(k2, (9, co, co), jnp.float32) * 0.1
        params.append((w1, w2))
        ci, co = co, co * 2
    return params


# ----------------------- pure-JAX reference (sanity) -----------------------
def _conv_block_ref(x_nchw, w1, w2):
    def conv(x, w9):
        co, ci = w9.shape[1], w9.shape[2]
        w_oihw = jnp.transpose(w9.reshape(3, 3, co, ci), (2, 3, 0, 1))
        return jax.lax.conv_general_dilated(
            x, w_oihw, (1, 1), ((1, 1), (1, 1)),
            dimension_numbers=("NCHW", "OIHW", "NCHW"))

    def inorm_lrelu(y):
        m = jnp.mean(y, axis=(2, 3), keepdims=True)
        v = jnp.mean(jnp.square(y - m), axis=(2, 3), keepdims=True)
        y = (y - m) * jax.lax.rsqrt(v + 1e-5)
        return jnp.where(y >= 0, y, 0.2 * y)

    hcur = inorm_lrelu(conv(x_nchw, w1))
    hcur = inorm_lrelu(conv(hcur, w2))
    n, c, hh, ww = hcur.shape
    pooled = hcur.reshape(n, c, hh // 2, 2, ww // 2, 2).mean(axis=(3, 5))
    return hcur, pooled


def _encoder_ref(x_nchw, params):
    out = x_nchw.astype(jnp.float32)
    stack = []
    for (w1, w2) in params:
        block_out, out = _conv_block_ref(out, w1, w2)
        stack.append(block_out)
    return stack, out


if __name__ == "__main__":
    # Module config: Encoder(num_pool_layers=2, in_chans=4, chans=8, drop_prob=0.0)
    num_pool_layers, in_chans, chans = 2, 4, 8
    N, H, W = 2, 16, 16            # even batch keeps both v7x TensorCores busy

    key = jax.random.PRNGKey(0)
    key, kx = jax.random.split(key)
    x = jax.random.normal(kx, (N, in_chans, H, W), jnp.float32)   # NCHW

    params = init_encoder_params(key, num_pool_layers, in_chans, chans)

    stack, output = encoder_forward(x, params)
    stack = [jax.block_until_ready(s) for s in stack]
    output = jax.block_until_ready(output)

    # Numerical check against a pure-JAX reference of the same math.
    ref_stack, ref_output = _encoder_ref(x, params)
    for s, rs in zip(stack, ref_stack):
        assert s.shape == rs.shape
        assert jnp.allclose(s, rs, rtol=1e-3, atol=1e-3), "stack mismatch"
    assert jnp.allclose(output, ref_output, rtol=1e-3, atol=1e-3), "output mismatch"

    # Shape checks matching the PyTorch module semantics.
    assert stack[0].shape == (N, chans, H, W)
    assert stack[1].shape == (N, chans * 2, H // 2, W // 2)
    assert output.shape == (N, chans * 2, H // 4, W // 4)

    print("KERNEL_OK")
</pallas_src>

<mosaic_0001>
module attributes {stable_mosaic.version = 11 : i64} {
  func.func @kernel(%arg0: i32, %arg1: memref<1x4x256xf32, #tpu.memory_space<vmem>>, %arg2: memref<9x8x4xf32, #tpu.memory_space<vmem>>, %arg3: memref<9x8x8xf32, #tpu.memory_space<vmem>>, %arg4: memref<256x64xf32, #tpu.memory_space<vmem>>, %arg5: memref<2x256xf32, #tpu.memory_space<vmem>>, %arg6: memref<9x16x8xf32, #tpu.memory_space<vmem>>, %arg7: memref<9x16x16xf32, #tpu.memory_space<vmem>>, %arg8: memref<64x16xf32, #tpu.memory_space<vmem>>, %arg9: memref<2x64xf32, #tpu.memory_space<vmem>>, %arg10: memref<1x8x256xf32, #tpu.memory_space<vmem>>, %arg11: memref<1x16x64xf32, #tpu.memory_space<vmem>>, %arg12: memref<1x16x16xf32, #tpu.memory_space<vmem>>, %arg13: memref<16x401xf32, #tpu.memory_space<vmem>>) attributes {dimension_semantics = [#tpu.dimension_semantics<parallel>], iteration_bounds = array<i64: 2>, scalar_prefetch = 0 : i64, scratch_operands = 1 : i64, tpu.core_type = #tpu.core_type<tc>, window_params = [{transform_indices = @transform_0, window_bounds = array<i64: 1, 4, 256>}, {pipeline_mode = #tpu.pipeline_mode<synchronous>, transform_indices = @transform_1, window_bounds = array<i64: 9, 8, 4>}, {pipeline_mode = #tpu.pipeline_mode<synchronous>, transform_indices = @transform_2, window_bounds = array<i64: 9, 8, 8>}, {pipeline_mode = #tpu.pipeline_mode<synchronous>, transform_indices = @transform_3, window_bounds = array<i64: 256, 64>}, {pipeline_mode = #tpu.pipeline_mode<synchronous>, transform_indices = @transform_4, window_bounds = array<i64: 2, 256>}, {pipeline_mode = #tpu.pipeline_mode<synchronous>, transform_indices = @transform_5, window_bounds = array<i64: 9, 16, 8>}, {pipeline_mode = #tpu.pipeline_mode<synchronous>, transform_indices = @transform_6, window_bounds = array<i64: 9, 16, 16>}, {pipeline_mode = #tpu.pipeline_mode<synchronous>, transform_indices = @transform_7, window_bounds = array<i64: 64, 16>}, {pipeline_mode = #tpu.pipeline_mode<synchronous>, transform_indices = @transform_8, window_bounds = array<i64: 2, 64>}, {transform_indices = @transform_9, window_bounds = array<i64: 1, 8, 256>}, {transform_indices = @transform_10, window_bounds = array<i64: 1, 16, 64>}, {transform_indices = @transform_11, window_bounds = array<i64: 1, 16, 16>}]} {
    %c0 = arith.constant 0 : index
    %c0_0 = arith.constant 0 : index
    %c0_1 = arith.constant 0 : index
    %0 = vector.load %arg1[%c0, %c0_0, %c0_1] : memref<1x4x256xf32, #tpu.memory_space<vmem>>, vector<1x4x256xf32>
    %1 = vector.shape_cast %0 : vector<1x4x256xf32> to vector<4x256xf32>
    %c0_2 = arith.constant 0 : index
    %c0_3 = arith.constant 0 : index
    %2 = vector.load %arg5[%c0_2, %c0_3] : memref<2x256xf32, #tpu.memory_space<vmem>>, vector<1x256xf32>
    %c1 = arith.constant 1 : index
    %c0_4 = arith.constant 0 : index
    %3 = vector.load %arg5[%c1, %c0_4] : memref<2x256xf32, #tpu.memory_space<vmem>>, vector<1x256xf32>
    %cst = arith.constant 0.000000e+00 : f32
    %4 = vector.broadcast %cst : f32 to vector<8x17xf32>
    %c0_5 = arith.constant 0 : index
    %c111 = arith.constant 111 : index
    %5 = vector.load %arg13[%c0_5, %c111] : memref<16x401xf32, #tpu.memory_space<vmem>>, vector<8x17xf32>
    tpu.vector_store %arg13[%c0_5, %c111], %4 {strides = array<i32>} : memref<16x401xf32, #tpu.memory_space<vmem>>, vector<8x17xf32>,
    %cst_6 = arith.constant 0.000000e+00 : f32
    %6 = vector.broadcast %cst_6 : f32 to vector<8x17xf32>
    %c0_7 = arith.constant 0 : index
    %c384 = arith.constant 384 : index
    %7 = vector.load %arg13[%c0_7, %c384] : memref<16x401xf32, #tpu.memory_space<vmem>>, vector<8x17xf32>
    tpu.vector_store %arg13[%c0_7, %c384], %6 {strides = array<i32>} : memref<16x401xf32, #tpu.memory_space<vmem>>, vector<8x17xf32>,
    %c0_8 = arith.constant 0 : index
    %c128 = arith.constant 128 : index
    %8 = vector.load %arg13[%c0_8, %c128] : memref<16x401xf32, #tpu.memory_space<vmem>>, vector<4x256xf32>
    tpu.vector_store %arg13[%c0_8, %c128], %1 {strides = array<i32>} : memref<16x401xf32, #tpu.memory_space<vmem>>, vector<4x256xf32>,
    %c0_9 = arith.constant 0 : index
    %c111_10 = arith.constant 111 : index
    %9 = vector.load %arg13[%c0_9, %c111_10] : memref<16x401xf32, #tpu.memory_space<vmem>>, vector<4x256xf32>
    %10 = vector.broadcast %2 : vector<1x256xf32> to vector<4x256xf32>
    %11 = arith.mulf %9, %10 : vector<4x256xf32>
    %c0_11 = arith.constant 0 : index
    %c0_12 = arith.constant 0 : index
    %c0_13 = arith.constant 0 : index
    %12 = vector.load %arg2[%c0_11, %c0_12, %c0_13] : memref<9x8x4xf32, #tpu.memory_space<vmem>>, vector<1x8x4xf32>
    %13 = vector.shape_cast %12 : vector<1x8x4xf32> to vector<8x4xf32>
    %cst_14 = arith.constant dense<0.000000e+00> : vector<8x256xf32>
    %14 = tpu.matmul %13, %11, %cst_14 {dimension_numbers = #tpu.dot_dimension_numbers<[1], [0], [0], [1], [0, 0, 1, 1], [], []>} : vector<8x4xf32>, vector<4x256xf32>, vector<8x256xf32> -> vector<8x256xf32>
    %c0_15 = arith.constant 0 : index
    %c112 = arith.constant 112 : index
    %15 = vector.load %arg13[%c0_15, %c112] : memref<16x401xf32, #tpu.memory_space<vmem>>, vector<4x256xf32>
    %c1_16 = arith.constant 1 : index
    %c0_17 = arith.constant 0 : index
    %c0_18 = arith.constant 0 : index
    %16 = vector.load %arg2[%c1_16, %c0_17, %c0_18] : memref<9x8x4xf32, #tpu.memory_space<vmem>>, vector<1x8x4xf32>
    %17 = vector.shape_cast %16 : vector<1x8x4xf32> to vector<8x4xf32>
    %cst_19 = arith.constant dense<0.000000e+00> : vector<8x256xf32>
    %18 = tpu.matmul %17, %15, %cst_19 {dimension_numbers = #tpu.dot_dimension_numbers<[1], [0], [0], [1], [0, 0, 1, 1], [], []>} : vector<8x4xf32>, vector<4x256xf32>, vector<8x256xf32> -> vector<8x256xf32>
    %19 = arith.addf %14, %18 : vector<8x256xf32>
    %c0_20 = arith.constant 0 : index
    %c113 = arith.constant 113 : index
    %20 = vector.load %arg13[%c0_20, %c113] : memref<16x401xf32, #tpu.memory_space<vmem>>, vector<4x256xf32>
    %21 = vector.broadcast %3 : vector<1x256xf32> to vector<4x256xf32>
    %22 = arith.mulf %20, %21 : vector<4x256xf32>
    %c2 = arith.constant 2 : index
    %c0_21 = arith.constant 0 : index
    %c0_22 = arith.constant 0 : index
    %23 = vector.load %arg2[%c2, %c0_21, %c0_22] : memref<9x8x4xf32, #tpu.memory_space<vmem>>, vector<1x8x4xf32>
    %24 = vector.shape_cast %23 : vector<1x8x4xf32> to vector<8x4xf32>
    %cst_23 = arith.constant dense<0.000000e+00> : vector<8x256xf32>
    %25 = tpu.matmul %24, %22, %cst_23 {dimension_numbers = #tpu.dot_dimension_numbers<[1], [0], [0], [1], [0, 0, 1, 1], [], []>} : vector<8x4xf32>, vector<4x256xf32>, vector<8x256xf32> -> vector<8x256xf32>
    %26 = arith.addf %19, %25 : vector<8x256xf32>
    %c0_24 = arith.constant 0 : index
    %c127 = arith.constant 127 : index
    %27 = vector.load %arg13[%c0_24, %c127] : memref<16x401xf32, #tpu.memory_space<vmem>>, vector<4x256xf32>
    %28 = vector.broadcast %2 : vector<1x256xf32> to vector<4x256xf32>
    %29 = arith.mulf %27, %28 : vector<4x256xf32>
    %c3 = arith.constant 3 : index
    %c0_25 = arith.constant 0 : index
    %c0_26 = arith.constant 0 : index
    %30 = vector.load %arg2[%c3, %c0_25, %c0_26] : memref<9x8x4xf32, #tpu.memory_space<vmem>>, vector<1x8x4xf32>
    %31 = vector.shape_cast %30 : vector<1x8x4xf32> to vector<8x4xf32>
    %cst_27 = arith.constant dense<0.000000e+00> : vector<8x256xf32>
    %32 = tpu.matmul %31, %29, %cst_27 {dimension_numbers = #tpu.dot_dimension_numbers<[1], [0], [0], [1], [0, 0, 1, 1], [], []>} : vector<8x4xf32>, vector<4x256xf32>, vector<8x256xf32> -> vector<8x256xf32>
    %33 = arith.addf %26, %32 : vector<8x256xf32>
    %c0_28 = arith.constant 0 : index
    %c128_29 = arith.constant 128 : index
    %34 = vector.load %arg13[%c0_28, %c128_29] : memref<16x401xf32, #tpu.memory_space<vmem>>, vector<4x256xf32>
    %c4 = arith.constant 4 : index
    %c0_30 = arith.constant 0 : index
    %c0_31 = arith.constant 0 : index
    %35 = vector.load %arg2[%c4, %c0_30, %c0_31] : memref<9x8x4xf32, #tpu.memory_space<vmem>>, vector<1x8x4xf32>
    %36 = vector.shape_cast %35 : vector<1x8x4xf32> to vector<8x4xf32>
    %cst_32 = arith.constant dense<0.000000e+00> : vector<8x256xf32>
    %37 = tpu.matmul %36, %34, %cst_32 {dimension_numbers = #tpu.dot_dimension_numbers<[1], [0], [0], [1], [0, 0, 1, 1], [], []>} : vector<8x4xf32>, vector<4x256xf32>, vector<8x256xf32> -> vector<8x256xf32>
    %38 = arith.addf %33, %37 : vector<8x256xf32>
    %c0_33 = arith.constant 0 : index
    %c129 = arith.constant 129 : index
    %39 = vector.load %arg13[%c0_33, %c129] : memref<16x401xf32, #tpu.memory_space<vmem>>, vector<4x256xf32>
    %40 = vector.broadcast %3 : vector<1x256xf32> to vector<4x256xf32>
    %41 = arith.mulf %39, %40 : vector<4x256xf32>
    %c5 = arith.constant 5 : index
    %c0_34 = arith.constant 0 : index
    %c0_35 = arith.constant 0 : index
    %42 = vector.load %arg2[%c5, %c0_34, %c0_35] : memref<9x8x4xf32, #tpu.memory_space<vmem>>, vector<1x8x4xf32>
    %43 = vector.shape_cast %42 : vector<1x8x4xf32> to vector<8x4xf32>
    %cst_36 = arith.constant dense<0.000000e+00> : vector<8x256xf32>
    %44 = tpu.matmul %43, %41, %cst_36 {dimension_numbers = #tpu.dot_dimension_numbers<[1], [0], [0], [1], [0, 0, 1, 1], [], []>} : vector<8x4xf32>, vector<4x256xf32>, vector<8x256xf32> -> vector<8x256xf32>
    %45 = arith.addf %38, %44 : vector<8x256xf32>
    %c0_37 = arith.constant 0 : index
    %c143 = arith.constant 143 : index
    %46 = vector.load %arg13[%c0_37, %c143] : memref<16x401xf32, #tpu.memory_space<vmem>>, vector<4x256xf32>
    %47 = vector.broadcast %2 : vector<1x256xf32> to vector<4x256xf32>
    %48 = arith.mulf %46, %47 : vector<4x256xf32>
    %c6 = arith.constant 6 : index
    %c0_38 = arith.constant 0 : index
    %c0_39 = arith.constant 0 : index
    %49 = vector.load %arg2[%c6, %c0_38, %c0_39] : memref<9x8x4xf32, #tpu.memory_space<vmem>>, vector<1x8x4xf32>
    %50 = vector.shape_cast %49 : vector<1x8x4xf32> to vector<8x4xf32>
    %cst_40 = arith.constant dense<0.000000e+00> : vector<8x256xf32>
    %51 = tpu.matmul %50, %48, %cst_40 {dimension_numbers = #tpu.dot_dimension_numbers<[1], [0], [0], [1], [0, 0, 1, 1], [], []>} : vector<8x4xf32>, vector<4x256xf32>, vector<8x256xf32> -> vector<8x256xf32>
    %52 = arith.addf %45, %51 : vector<8x256xf32>
    %c0_41 = arith.constant 0 : index
    %c144 = arith.constant 144 : index
    %53 = vector.load %arg13[%c0_41, %c144] : memref<16x401xf32, #tpu.memory_space<vmem>>, vector<4x256xf32>
    %c7 = arith.constant 7 : index
    %c0_42 = arith.constant 0 : index
    %c0_43 = arith.constant 0 : index
    %54 = vector.load %arg2[%c7, %c0_42, %c0_43] : memref<9x8x4xf32, #tpu.memory_space<vmem>>, vector<1x8x4xf32>
    %55 = vector.shape_cast %54 : vector<1x8x4xf32> to vector<8x4xf32>
    %cst_44 = arith.constant dense<0.000000e+00> : vector<8x256xf32>
    %56 = tpu.matmul %55, %53, %cst_44 {dimension_numbers = #tpu.dot_dimension_numbers<[1], [0], [0], [1], [0, 0, 1, 1], [], []>} : vector<8x4xf32>, vector<4x256xf32>, vector<8x256xf32> -> vector<8x256xf32>
    %57 = arith.addf %52, %56 : vector<8x256xf32>
    %c0_45 = arith.constant 0 : index
    %c145 = arith.constant 145 : index
    %58 = vector.load %arg13[%c0_45, %c145] : memref<16x401xf32, #tpu.memory_space<vmem>>, vector<4x256xf32>
    %59 = vector.broadcast %3 : vector<1x256xf32> to vector<4x256xf32>
    %60 = arith.mulf %58, %59 : vector<4x256xf32>
    %c8 = arith.constant 8 : index
    %c0_46 = arith.constant 0 : index
    %c0_47 = arith.constant 0 : index
    %61 = vector.load %arg2[%c8, %c0_46, %c0_47] : memref<9x8x4xf32, #tpu.memory_space<vmem>>, vector<1x8x4xf32>
    %62 = vector.shape_cast %61 : vector<1x8x4xf32> to vector<8x4xf32>
    %cst_48 = arith.constant dense<0.000000e+00> : vector<8x256xf32>
    %63 = tpu.matmul %62, %60, %cst_48 {dimension_numbers = #tpu.dot_dimension_numbers<[1], [0], [0], [1], [0, 0, 1, 1], [], []>} : vector<8x4xf32>, vector<4x256xf32>, vector<8x256xf32> -> vector<8x256xf32>
    %64 = arith.addf %57, %63 : vector<8x256xf32>
    %cst_49 = arith.constant dense<0.000000e+00> : vector<8xf32>
    %65 = vector.multi_reduction <add>, %64, %cst_49 [1] : vector<8x256xf32> to vector<8xf32>
    %66 = vector.shape_cast %65 : vector<8xf32> to vector<8x1xf32>
    %67 = arith.mulf %64, %64 : vector<8x256xf32>
    %cst_50 = arith.constant dense<0.000000e+00> : vector<8xf32>
    %68 = vector.multi_reduction <add>, %67, %cst_50 [1] : vector<8x256xf32> to vector<8xf32>
    %69 = vector.shape_cast %68 : vector<8xf32> to vector<8x1xf32>
    %cst_51 = arith.constant 3.906250e-03 : f32
    %70 = vector.broadcast %cst_51 : f32 to vector<8x1xf32>
    %71 = arith.mulf %66, %70 : vector<8x1xf32>
    %cst_52 = arith.constant 3.906250e-03 : f32
    %72 = vector.broadcast %cst_52 : f32 to vector<8x1xf32>
    %73 = arith.mulf %69, %72 : vector<8x1xf32>
    %74 = arith.mulf %71, %71 : vector<8x1xf32>
    %75 = arith.subf %73, %74 : vector<8x1xf32>
    %cst_53 = arith.constant 0.000000e+00 : f32
    %76 = vector.broadcast %cst_53 : f32 to vector<8x1xf32>
    %77 = arith.maximumf %75, %76 : vector<8x1xf32>
    %78 = vector.broadcast %71 : vector<8x1xf32> to vector<8x256xf32>
    %79 = arith.subf %64, %78 : vector<8x256xf32>
    %cst_54 = arith.constant 9.99999974E-6 : f32
    %80 = vector.broadcast %cst_54 : f32 to vector<8x1xf32>
    %81 = arith.addf %77, %80 : vector<8x1xf32>
    %82 = math.rsqrt %81 : vector<8x1xf32>
    %83 = vector.broadcast %82 : vector<8x1xf32> to vector<8x256xf32>
    %84 = arith.mulf %79, %83 : vector<8x256xf32>
    %cst_55 = arith.constant 0.000000e+00 : f32
    %85 = vector.broadcast %cst_55 : f32 to vector<8x256xf32>
    %86 = arith.cmpf oge, %84, %85 : vector<8x256xf32>
    %cst_56 = arith.constant 2.000000e-01 : f32
    %87 = vector.broadcast %cst_56 : f32 to vector<8x256xf32>
    %88 = arith.mulf %87, %84 : vector<8x256xf32>
    %89 = arith.select %86, %84, %88 : vector<8x256xi1>, vector<8x256xf32>
    %c0_57 = arith.constant 0 : index
    %c128_58 = arith.constant 128 : index
    %90 = vector.load %arg13[%c0_57, %c128_58] : memref<16x401xf32, #tpu.memory_space<vmem>>, vector<8x256xf32>
    tpu.vector_store %arg13[%c0_57, %c128_58], %89 {strides = array<i32>} : memref<16x401xf32, #tpu.memory_space<vmem>>, vector<8x256xf32>,
    %c0_59 = arith.constant 0 : index
    %c111_60 = arith.constant 111 : index
    %91 = vector.load %arg13[%c0_59, %c111_60] : memref<16x401xf32, #tpu.memory_space<vmem>>, vector<8x256xf32>
    %92 = vector.broadcast %2 : vector<1x256xf32> to vector<8x256xf32>
    %93 = arith.mulf %91, %92 : vector<8x256xf32>
    %c0_61 = arith.constant 0 : index
    %c0_62 = arith.constant 0 : index
    %c0_63 = arith.constant 0 : index
    %94 = vector.load %arg3[%c0_61, %c0_62, %c0_63] : memref<9x8x8xf32, #tpu.memory_space<vmem>>, vector<1x8x8xf32>
    %95 = vector.shape_cast %94 : vector<1x8x8xf32> to vector<8x8xf32>
    %cst_64 = arith.constant dense<0.000000e+00> : vector<8x256xf32>
    %96 = tpu.matmul %95, %93, %cst_64 {dimension_numbers = #tpu.dot_dimension_numbers<[1], [0], [0], [1], [0, 0, 1, 1], [], []>} : vector<8x8xf32>, vector<8x256xf32>, vector<8x256xf32> -> vector<8x256xf32>
    %c0_65 = arith.constant 0 : index
    %c112_66 = arith.constant 112 : index
    %97 = vector.load %arg13[%c0_65, %c112_66] : memref<16x401xf32, #tpu.memory_space<vmem>>, vector<8x256xf32>
    %c1_67 = arith.constant 1 : index
    %c0_68 = arith.constant 0 : index
    %c0_69 = arith.constant 0 : index
    %98 = vector.load %arg3[%c1_67, %c0_68, %c0_69] : memref<9x8x8xf32, #tpu.memory_space<vmem>>, vector<1x8x8xf32>
    %99 = vector.shape_cast %98 : vector<1x8x8xf32> to vector<8x8xf32>
    %cst_70 = arith.constant dense<0.000000e+00> : vector<8x256xf32>
    %100 = tpu.matmul %99, %97, %cst_70 {dimension_numbers = #tpu.dot_dimension_numbers<[1], [0], [0], [1], [0, 0, 1, 1], [], []>} : vector<8x8xf32>, vector<8x256xf32>, vector<8x256xf32> -> vector<8x256xf32>
    %101 = arith.addf %96, %100 : vector<8x256xf32>
    %c0_71 = arith.constant 0 : index
    %c113_72 = arith.constant 113 : index
    %102 = vector.load %arg13[%c0_71, %c113_72] : memref<16x401xf32, #tpu.memory_space<vmem>>, vector<8x256xf32>
    %103 = vector.broadcast %3 : vector<1x256xf32> to vector<8x256xf32>
    %104 = arith.mulf %102, %103 : vector<8x256xf32>
    %c2_73 = arith.constant 2 : index
    %c0_74 = arith.constant 0 : index
    %c0_75 = arith.constant 0 : index
    %105 = vector.load %arg3[%c2_73, %c0_74, %c0_75] : memref<9x8x8xf32, #tpu.memory_space<vmem>>, vector<1x8x8xf32>
    %106 = vector.shape_cast %105 : vector<1x8x8xf32> to vector<8x8xf32>
    %cst_76 = arith.constant dense<0.000000e+00> : vector<8x256xf32>
    %107 = tpu.matmul %106, %104, %cst_76 {dimension_numbers = #tpu.dot_dimension_numbers<[1], [0], [0], [1], [0, 0, 1, 1], [], []>} : vector<8x8xf32>, vector<8x256xf32>, vector<8x256xf32> -> vector<8x256xf32>
    %108 = arith.addf %101, %107 : vector<8x256xf32>
    %c0_77 = arith.constant 0 : index
    %c127_78 = arith.constant 127 : index
    %109 = vector.load %arg13[%c0_77, %c127_78] : memref<16x401xf32, #tpu.memory_space<vmem>>, vector<8x256xf32>
    %110 = vector.broadcast %2 : vector<1x256xf32> to vector<8x256xf32>
    %111 = arith.mulf %109, %110 : vector<8x256xf32>
    %c3_79 = arith.constant 3 : index
    %c0_80 = arith.constant 0 : index
    %c0_81 = arith.constant 0 : index
    %112 = vector.load %arg3[%c3_79, %c0_80, %c0_81] : memref<9x8x8xf32, #tpu.memory_space<vmem>>, vector<1x8x8xf32>
    %113 = vector.shape_cast %112 : vector<1x8x8xf32> to vector<8x8xf32>
    %cst_82 = arith.constant dense<0.000000e+00> : vector<8x256xf32>
    %114 = tpu.matmul %113, %111, %cst_82 {dimension_numbers = #tpu.dot_dimension_numbers<[1], [0], [0], [1], [0, 0, 1, 1], [], []>} : vector<8x8xf32>, vector<8x256xf32>, vector<8x256xf32> -> vector<8x256xf32>
    %115 = arith.addf %108, %114 : vector<8x256xf32>
    %c0_83 = arith.constant 0 : index
    %c128_84 = arith.constant 128 : index
    %116 = vector.load %arg13[%c0_83, %c128_84] : memref<16x401xf32, #tpu.memory_space<vmem>>, vector<8x256xf32>
    %c4_85 = arith.constant 4 : index
    %c0_86 = arith.constant 0 : index
    %c0_87 = arith.constant 0 : index
    %117 = vector.load %arg3[%c4_85, %c0_86, %c0_87] : memref<9x8x8xf32, #tpu.memory_space<vmem>>, vector<1x8x8xf32>
    %118 = vector.shape_cast %117 : vector<1x8x8xf32> to vector<8x8xf32>
    %cst_88 = arith.constant dense<0.000000e+00> : vector<8x256xf32>
    %119 = tpu.matmul %118, %116, %cst_88 {dimension_numbers = #tpu.dot_dimension_numbers<[1], [0], [0], [1], [0, 0, 1, 1], [], []>} : vector<8x8xf32>, vector<8x256xf32>, vector<8x256xf32> -> vector<8x256xf32>
    %120 = arith.addf %115, %119 : vector<8x256xf32>
    %c0_89 = arith.constant 0 : index
    %c129_90 = arith.constant 129 : index
    %121 = vector.load %arg13[%c0_89, %c129_90] : memref<16x401xf32, #tpu.memory_space<vmem>>, vector<8x256xf32>
    %122 = vector.broadcast %3 : vector<1x256xf32> to vector<8x256xf32>
    %123 = arith.mulf %121, %122 : vector<8x256xf32>
    %c5_91 = arith.constant 5 : index
    %c0_92 = arith.constant 0 : index
    %c0_93 = arith.constant 0 : index
    %124 = vector.load %arg3[%c5_91, %c0_92, %c0_93] : memref<9x8x8xf32, #tpu.memory_space<vmem>>, vector<1x8x8xf32>
    %125 = vector.shape_cast %124 : vector<1x8x8xf32> to vector<8x8xf32>
    %cst_94 = arith.constant dense<0.000000e+00> : vector<8x256xf32>
    %126 = tpu.matmul %125, %123, %cst_94 {dimension_numbers = #tpu.dot_dimension_numbers<[1], [0], [0], [1], [0, 0, 1, 1], [], []>} : vector<8x8xf32>, vector<8x256xf32>, vector<8x256xf32> -> vector<8x256xf32>
    %127 = arith.addf %120, %126 : vector<8x256xf32>
    %c0_95 = arith.constant 0 : index
    %c143_96 = arith.constant 143 : index
    %128 = vector.load %arg13[%c0_95, %c143_96] : memref<16x401xf32, #tpu.memory_space<vmem>>, vector<8x256xf32>
    %129 = vector.broadcast %2 : vector<1x256xf32> to vector<8x256xf32>
    %130 = arith.mulf %128, %129 : vector<8x256xf32>
    %c6_97 = arith.constant 6 : index
    %c0_98 = arith.constant 0 : index
    %c0_99 = arith.constant 0 : index
    %131 = vector.load %arg3[%c6_97, %c0_98, %c0_99] : memref<9x8x8xf32, #tpu.memory_space<vmem>>, vector<1x8x8xf32>
    %132 = vector.shape_cast %131 : vector<1x8x8xf32> to vector<8x8xf32>
    %cst_100 = arith.constant dense<0.000000e+00> : vector<8x256xf32>
    %133 = tpu.matmul %132, %130, %cst_100 {dimension_numbers = #tpu.dot_dimension_numbers<[1], [0], [0], [1], [0, 0, 1, 1], [], []>} : vector<8x8xf32>, vector<8x256xf32>, vector<8x256xf32> -> vector<8x256xf32>
    %134 = arith.addf %127, %133 : vector<8x256xf32>
    %c0_101 = arith.constant 0 : index
    %c144_102 = arith.constant 144 : index
    %135 = vector.load %arg13[%c0_101, %c144_102] : memref<16x401xf32, #tpu.memory_space<vmem>>, vector<8x256xf32>
    %c7_103 = arith.constant 7 : index
    %c0_104 = arith.constant 0 : index
    %c0_105 = arith.constant 0 : index
    %136 = vector.load %arg3[%c7_103, %c0_104, %c0_105] : memref<9x8x8xf32, #tpu.memory_space<vmem>>, vector<1x8x8xf32>
    %137 = vector.shape_cast %136 : vector<1x8x8xf32> to vector<8x8xf32>
    %cst_106 = arith.constant dense<0.000000e+00> : vector<8x256xf32>
    %138 = tpu.matmul %137, %135, %cst_106 {dimension_numbers = #tpu.dot_dimension_numbers<[1], [0], [0], [1], [0, 0, 1, 1], [], []>} : vector<8x8xf32>, vector<8x256xf32>, vector<8x256xf32> -> vector<8x256xf32>
    %139 = arith.addf %134, %138 : vector<8x256xf32>
    %c0_107 = arith.constant 0 : index
    %c145_108 = arith.constant 145 : index
    %140 = vector.load %arg13[%c0_107, %c145_108] : memref<16x401xf32, #tpu.memory_space<vmem>>, vector<8x256xf32>
    %141 = vector.broadcast %3 : vector<1x256xf32> to vector<8x256xf32>
    %142 = arith.mulf %140, %141 : vector<8x256xf32>
    %c8_109 = arith.constant 8 : index
    %c0_110 = arith.constant 0 : index
    %c0_111 = arith.constant 0 : index
    %143 = vector.load %arg3[%c8_109, %c0_110, %c0_111] : memref<9x8x8xf32, #tpu.memory_space<vmem>>, vector<1x8x8xf32>
    %144 = vector.shape_cast %143 : vector<1x8x8xf32> to vector<8x8xf32>
    %cst_112 = arith.constant dense<0.000000e+00> : vector<8x256xf32>
    %145 = tpu.matmul %144, %142, %cst_112 {dimension_numbers = #tpu.dot_dimension_numbers<[1], [0], [0], [1], [0, 0, 1, 1], [], []>} : vector<8x8xf32>, vector<8x256xf32>, vector<8x256xf32> -> vector<8x256xf32>
    %146 = arith.addf %139, %145 : vector<8x256xf32>
    %cst_113 = arith.constant dense<0.000000e+00> : vector<8xf32>
    %147 = vector.multi_reduction <add>, %146, %cst_113 [1] : vector<8x256xf32> to vector<8xf32>
    %148 = vector.shape_cast %147 : vector<8xf32> to vector<8x1xf32>
    %149 = arith.mulf %146, %146 : vector<8x256xf32>
    %cst_114 = arith.constant dense<0.000000e+00> : vector<8xf32>
    %150 = vector.multi_reduction <add>, %149, %cst_114 [1] : vector<8x256xf32> to vector<8xf32>
    %151 = vector.shape_cast %150 : vector<8xf32> to vector<8x1xf32>
    %cst_115 = arith.constant 3.906250e-03 : f32
    %152 = vector.broadcast %cst_115 : f32 to vector<8x1xf32>
    %153 = arith.mulf %148, %152 : vector<8x1xf32>
    %cst_116 = arith.constant 3.906250e-03 : f32
    %154 = vector.broadcast %cst_116 : f32 to vector<8x1xf32>
    %155 = arith.mulf %151, %154 : vector<8x1xf32>
    %156 = arith.mulf %153, %153 : vector<8x1xf32>
    %157 = arith.subf %155, %156 : vector<8x1xf32>
    %cst_117 = arith.constant 0.000000e+00 : f32
    %158 = vector.broadcast %cst_117 : f32 to vector<8x1xf32>
    %159 = arith.maximumf %157, %158 : vector<8x1xf32>
    %160 = vector.broadcast %153 : vector<8x1xf32> to vector<8x256xf32>
    %161 = arith.subf %146, %160 : vector<8x256xf32>
    %cst_118 = arith.constant 9.99999974E-6 : f32
    %162 = vector.broadcast %cst_118 : f32 to vector<8x1xf32>
    %163 = arith.addf %159, %162 : vector<8x1xf32>
    %164 = math.rsqrt %163 : vector<8x1xf32>
    %165 = vector.broadcast %164 : vector<8x1xf32> to vector<8x256xf32>
    %166 = arith.mulf %161, %165 : vector<8x256xf32>
    %cst_119 = arith.constant 0.000000e+00 : f32
    %167 = vector.broadcast %cst_119 : f32 to vector<8x256xf32>
    %168 = arith.cmpf oge, %166, %167 : vector<8x256xf32>
    %cst_120 = arith.constant 2.000000e-01 : f32
    %169 = vector.broadcast %cst_120 : f32 to vector<8x256xf32>
    %170 = arith.mulf %169, %166 : vector<8x256xf32>
    %171 = arith.select %168, %166, %170 : vector<8x256xi1>, vector<8x256xf32>
    %c0_121 = arith.constant 0 : index
    %c0_122 = arith.constant 0 : index
    %c0_123 = arith.constant 0 : index
    %172 = vector.load %arg10[%c0_121, %c0_122, %c0_123] : memref<1x8x256xf32, #tpu.memory_space<vmem>>, vector<1x8x256xf32>
    %173 = vector.shape_cast %172 : vector<1x8x256xf32> to vector<8x256xf32>
    %174 = vector.shape_cast %171 : vector<8x256xf32> to vector<1x8x256xf32>
    tpu.vector_store %arg10[%c0_121, %c0_122, %c0_123], %174 {strides = array<i32>} : memref<1x8x256xf32, #tpu.memory_space<vmem>>, vector<1x8x256xf32>,
    %c0_124 = arith.constant 0 : index
    %c0_125 = arith.constant 0 : index
    %175 = vector.load %arg4[%c0_124, %c0_125] : memref<256x64xf32, #tpu.memory_space<vmem>>, vector<256x64xf32>
    %cst_126 = arith.constant dense<0.000000e+00> : vector<8x64xf32>
    %176 = tpu.matmul %171, %175, %cst_126 {dimension_numbers = #tpu.dot_dimension_numbers<[1], [0], [0], [1], [0, 0, 1, 1], [], []>} : vector<8x256xf32>, vector<256x64xf32>, vector<8x64xf32> -> vector<8x64xf32>
    %c0_127 = arith.constant 0 : index
    %c0_128 = arith.constant 0 : index
    %177 = vector.load %arg9[%c0_127, %c0_128] : memref<2x64xf32, #tpu.memory_space<vmem>>, vector<1x64xf32>
    %c1_129 = arith.constant 1 : index
    %c0_130 = arith.constant 0 : index
    %178 = vector.load %arg9[%c1_129, %c0_130] : memref<2x64xf32, #tpu.memory_space<vmem>>, vector<1x64xf32>
    %cst_131 = arith.constant 0.000000e+00 : f32
    %179 = vector.broadcast %cst_131 : f32 to vector<16x9xf32>
    %c0_132 = arith.constant 0 : index
    %c119 = arith.constant 119 : index
    %180 = vector.load %arg13[%c0_132, %c119] : memref<16x401xf32, #tpu.memory_space<vmem>>, vector<16x9xf32>
    tpu.vector_store %arg13[%c0_132, %c119], %179 {strides = array<i32>} : memref<16x401xf32, #tpu.memory_space<vmem>>, vector<16x9xf32>,
    %cst_133 = arith.constant 0.000000e+00 : f32
    %181 = vector.broadcast %cst_133 : f32 to vector<16x9xf32>
    %c0_134 = arith.constant 0 : index
    %c192 = arith.constant 192 : index
    %182 = vector.load %arg13[%c0_134, %c192] : memref<16x401xf32, #tpu.memory_space<vmem>>, vector<16x9xf32>
    tpu.vector_store %arg13[%c0_134, %c192], %181 {strides = array<i32>} : memref<16x401xf32, #tpu.memory_space<vmem>>, vector<16x9xf32>,
    %c0_135 = arith.constant 0 : index
    %c128_136 = arith.constant 128 : index
    %183 = vector.load %arg13[%c0_135, %c128_136] : memref<16x401xf32, #tpu.memory_space<vmem>>, vector<8x64xf32>
    tpu.vector_store %arg13[%c0_135, %c128_136], %176 {strides = array<i32>} : memref<16x401xf32, #tpu.memory_space<vmem>>, vector<8x64xf32>,
    %c0_137 = arith.constant 0 : index
    %c119_138 = arith.constant 119 : index
    %184 = vector.load %arg13[%c0_137, %c119_138] : memref<16x401xf32, #tpu.memory_space<vmem>>, vector<8x64xf32>
    %185 = vector.broadcast %177 : vector<1x64xf32> to vector<8x64xf32>
    %186 = arith.mulf %184, %185 : vector<8x64xf32>
    %c0_139 = arith.constant 0 : index
    %c0_140 = arith.constant 0 : index
    %c0_141 = arith.constant 0 : index
    %187 = vector.load %arg6[%c0_139, %c0_140, %c0_141] : memref<9x16x8xf32, #tpu.memory_space<vmem>>, vector<1x16x8xf32>
    %188 = vector.shape_cast %187 : vector<1x16x8xf32> to vector<16x8xf32>
    %cst_142 = arith.constant dense<0.000000e+00> : vector<16x64xf32>
    %189 = tpu.matmul %188, %186, %cst_142 {dimension_numbers = #tpu.dot_dimension_numbers<[1], [0], [0], [1], [0, 0, 1, 1], [], []>} : vector<16x8xf32>, vector<8x64xf32>, vector<16x64xf32> -> vector<16x64xf32>
    %c0_143 = arith.constant 0 : index
    %c120 = arith.constant 120 : index
    %190 = vector.load %arg13[%c0_143, %c120] : memref<16x401xf32, #tpu.memory_space<vmem>>, vector<8x64xf32>
    %c1_144 = arith.constant 1 : index
    %c0_145 = arith.constant 0 : index
    %c0_146 = arith.constant 0 : index
    %191 = vector.load %arg6[%c1_144, %c0_145, %c0_146] : memref<9x16x8xf32, #tpu.memory_space<vmem>>, vector<1x16x8xf32>
    %192 = vector.shape_cast %191 : vector<1x16x8xf32> to vector<16x8xf32>
    %cst_147 = arith.constant dense<0.000000e+00> : vector<16x64xf32>
    %193 = tpu.matmul %192, %190, %cst_147 {dimension_numbers = #tpu.dot_dimension_numbers<[1], [0], [0], [1], [0, 0, 1, 1], [], []>} : vector<16x8xf32>, vector<8x64xf32>, vector<16x64xf32> -> vector<16x64xf32>
    %194 = arith.addf %189, %193 : vector<16x64xf32>
    %c0_148 = arith.constant 0 : index
    %c121 = arith.constant 121 : index
    %195 = vector.load %arg13[%c0_148, %c121] : memref<16x401xf32, #tpu.memory_space<vmem>>, vector<8x64xf32>
    %196 = vector.broadcast %178 : vector<1x64xf32> to vector<8x64xf32>
    %197 = arith.mulf %195, %196 : vector<8x64xf32>
    %c2_149 = arith.constant 2 : index
    %c0_150 = arith.constant 0 : index
    %c0_151 = arith.constant 0 : index
    %198 = vector.load %arg6[%c2_149, %c0_150, %c0_151] : memref<9x16x8xf32, #tpu.memory_space<vmem>>, vector<1x16x8xf32>
    %199 = vector.shape_cast %198 : vector<1x16x8xf32> to vector<16x8xf32>
    %cst_152 = arith.constant dense<0.000000e+00> : vector<16x64xf32>
    %200 = tpu.matmul %199, %197, %cst_152 {dimension_numbers = #tpu.dot_dimension_numbers<[1], [0], [0], [1], [0, 0, 1, 1], [], []>} : vector<16x8xf32>, vector<8x64xf32>, vector<16x64xf32> -> vector<16x64xf32>
    %201 = arith.addf %194, %200 : vector<16x64xf32>
    %c0_153 = arith.constant 0 : index
    %c127_154 = arith.constant 127 : index
    %202 = vector.load %arg13[%c0_153, %c127_154] : memref<16x401xf32, #tpu.memory_space<vmem>>, vector<8x64xf32>
    %203 = vector.broadcast %177 : vector<1x64xf32> to vector<8x64xf32>
    %204 = arith.mulf %202, %203 : vector<8x64xf32>
    %c3_155 = arith.constant 3 : index
    %c0_156 = arith.constant 0 : index
    %c0_157 = arith.constant 0 : index
    %205 = vector.load %arg6[%c3_155, %c0_156, %c0_157] : memref<9x16x8xf32, #tpu.memory_space<vmem>>, vector<1x16x8xf32>
    %206 = vector.shape_cast %205 : vector<1x16x8xf32> to vector<16x8xf32>
    %cst_158 = arith.constant dense<0.000000e+00> : vector<16x64xf32>
    %207 = tpu.matmul %206, %204, %cst_158 {dimension_numbers = #tpu.dot_dimension_numbers<[1], [0], [0], [1], [0, 0, 1, 1], [], []>} : vector<16x8xf32>, vector<8x64xf32>, vector<16x64xf32> -> vector<16x64xf32>
    %208 = arith.addf %201, %207 : vector<16x64xf32>
    %c0_159 = arith.constant 0 : index
    %c128_160 = arith.constant 128 : index
    %209 = vector.load %arg13[%c0_159, %c128_160] : memref<16x401xf32, #tpu.memory_space<vmem>>, vector<8x64xf32>
    %c4_161 = arith.constant 4 : index
    %c0_162 = arith.constant 0 : index
    %c0_163 = arith.constant 0 : index
    %210 = vector.load %arg6[%c4_161, %c0_162, %c0_163] : memref<9x16x8xf32, #tpu.memory_space<vmem>>, vector<1x16x8xf32>
    %211 = vector.shape_cast %210 : vector<1x16x8xf32> to vector<16x8xf32>
    %cst_164 = arith.constant dense<0.000000e+00> : vector<16x64xf32>
    %212 = tpu.matmul %211, %209, %cst_164 {dimension_numbers = #tpu.dot_dimension_numbers<[1], [0], [0], [1], [0, 0, 1, 1], [], []>} : vector<16x8xf32>, vector<8x64xf32>, vector<16x64xf32> -> vector<16x64xf32>
    %213 = arith.addf %208, %212 : vector<16x64xf32>
    %c0_165 = arith.constant 0 : index
    %c129_166 = arith.constant 129 : index
    %214 = vector.load %arg13[%c0_165, %c129_166] : memref<16x401xf32, #tpu.memory_space<vmem>>, vector<8x64xf32>
    %215 = vector.broadcast %178 : vector<1x64xf32> to vector<8x64xf32>
    %216 = arith.mulf %214, %215 : vector<8x64xf32>
    %c5_167 = arith.constant 5 : index
    %c0_168 = arith.constant 0 : index
    %c0_169 = arith.constant 0 : index
    %217 = vector.load %arg6[%c5_167, %c0_168, %c0_169] : memref<9x16x8xf32, #tpu.memory_space<vmem>>, vector<1x16x8xf32>
    %218 = vector.shape_cast %217 : vector<1x16x8xf32> to vector<16x8xf32>
    %cst_170 = arith.constant dense<0.000000e+00> : vector<16x64xf32>
    %219 = tpu.matmul %218, %216, %cst_170 {dimension_numbers = #tpu.dot_dimension_numbers<[1], [0], [0], [1], [0, 0, 1, 1], [], []>} : vector<16x8xf32>, vector<8x64xf32>, vector<16x64xf32> -> vector<16x64xf32>
    %220 = arith.addf %213, %219 : vector<16x64xf32>
    %c0_171 = arith.constant 0 : index
    %c135 = arith.constant 135 : index
    %221 = vector.load %arg13[%c0_171, %c135] : memref<16x401xf32, #tpu.memory_space<vmem>>, vector<8x64xf32>
    %222 = vector.broadcast %177 : vector<1x64xf32> to vector<8x64xf32>
    %223 = arith.mulf %221, %222 : vector<8x64xf32>
    %c6_172 = arith.constant 6 : index
    %c0_173 = arith.constant 0 : index
    %c0_174 = arith.constant 0 : index
    %224 = vector.load %arg6[%c6_172, %c0_173, %c0_174] : memref<9x16x8xf32, #tpu.memory_space<vmem>>, vector<1x16x8xf32>
    %225 = vector.shape_cast %224 : vector<1x16x8xf32> to vector<16x8xf32>
    %cst_175 = arith.constant dense<0.000000e+00> : vector<16x64xf32>
    %226 = tpu.matmul %225, %223, %cst_175 {dimension_numbers = #tpu.dot_dimension_numbers<[1], [0], [0], [1], [0, 0, 1, 1], [], []>} : vector<16x8xf32>, vector<8x64xf32>, vector<16x64xf32> -> vector<16x64xf32>
    %227 = arith.addf %220, %226 : vector<16x64xf32>
    %c0_176 = arith.constant 0 : index
    %c136 = arith.constant 136 : index
    %228 = vector.load %arg13[%c0_176, %c136] : memref<16x401xf32, #tpu.memory_space<vmem>>, vector<8x64xf32>
    %c7_177 = arith.constant 7 : index
    %c0_178 = arith.constant 0 : index
    %c0_179 = arith.constant 0 : index
    %229 = vector.load %arg6[%c7_177, %c0_178, %c0_179] : memref<9x16x8xf32, #tpu.memory_space<vmem>>, vector<1x16x8xf32>
    %230 = vector.shape_cast %229 : vector<1x16x8xf32> to vector<16x8xf32>
    %cst_180 = arith.constant dense<0.000000e+00> : vector<16x64xf32>
    %231 = tpu.matmul %230, %228, %cst_180 {dimension_numbers = #tpu.dot_dimension_numbers<[1], [0], [0], [1], [0, 0, 1, 1], [], []>} : vector<16x8xf32>, vector<8x64xf32>, vector<16x64xf32> -> vector<16x64xf32>
    %232 = arith.addf %227, %231 : vector<16x64xf32>
    %c0_181 = arith.constant 0 : index
    %c137 = arith.constant 137 : index
    %233 = vector.load %arg13[%c0_181, %c137] : memref<16x401xf32, #tpu.memory_space<vmem>>, vector<8x64xf32>
    %234 = vector.broadcast %178 : vector<1x64xf32> to vector<8x64xf32>
    %235 = arith.mulf %233, %234 : vector<8x64xf32>
    %c8_182 = arith.constant 8 : index
    %c0_183 = arith.constant 0 : index
    %c0_184 = arith.constant 0 : index
    %236 = vector.load %arg6[%c8_182, %c0_183, %c0_184] : memref<9x16x8xf32, #tpu.memory_space<vmem>>, vector<1x16x8xf32>
    %237 = vector.shape_cast %236 : vector<1x16x8xf32> to vector<16x8xf32>
    %cst_185 = arith.constant dense<0.000000e+00> : vector<16x64xf32>
    %238 = tpu.matmul %237, %235, %cst_185 {dimension_numbers = #tpu.dot_dimension_numbers<[1], [0], [0], [1], [0, 0, 1, 1], [], []>} : vector<16x8xf32>, vector<8x64xf32>, vector<16x64xf32> -> vector<16x64xf32>
    %239 = arith.addf %232, %238 : vector<16x64xf32>
    %cst_186 = arith.constant dense<0.000000e+00> : vector<16xf32>
    %240 = vector.multi_reduction <add>, %239, %cst_186 [1] : vector<16x64xf32> to vector<16xf32>
    %241 = vector.shape_cast %240 : vector<16xf32> to vector<16x1xf32>
    %242 = arith.mulf %239, %239 : vector<16x64xf32>
    %cst_187 = arith.constant dense<0.000000e+00> : vector<16xf32>
    %243 = vector.multi_reduction <add>, %242, %cst_187 [1] : vector<16x64xf32> to vector<16xf32>
    %244 = vector.shape_cast %243 : vector<16xf32> to vector<16x1xf32>
    %cst_188 = arith.constant 1.562500e-02 : f32
    %245 = vector.broadcast %cst_188 : f32 to vector<16x1xf32>
    %246 = arith.mulf %241, %245 : vector<16x1xf32>
    %cst_189 = arith.constant 1.562500e-02 : f32
    %247 = vector.broadcast %cst_189 : f32 to vector<16x1xf32>
    %248 = arith.mulf %244, %247 : vector<16x1xf32>
    %249 = arith.mulf %246, %246 : vector<16x1xf32>
    %250 = arith.subf %248, %249 : vector<16x1xf32>
    %cst_190 = arith.constant 0.000000e+00 : f32
    %251 = vector.broadcast %cst_190 : f32 to vector<16x1xf32>
    %252 = arith.maximumf %250, %251 : vector<16x1xf32>
    %253 = vector.broadcast %246 : vector<16x1xf32> to vector<16x64xf32>
    %254 = arith.subf %239, %253 : vector<16x64xf32>
    %cst_191 = arith.constant 9.99999974E-6 : f32
    %255 = vector.broadcast %cst_191 : f32 to vector<16x1xf32>
    %256 = arith.addf %252, %255 : vector<16x1xf32>
    %257 = math.rsqrt %256 : vector<16x1xf32>
    %258 = vector.broadcast %257 : vector<16x1xf32> to vector<16x64xf32>
    %259 = arith.mulf %254, %258 : vector<16x64xf32>
    %cst_192 = arith.constant 0.000000e+00 : f32
    %260 = vector.broadcast %cst_192 : f32 to vector<16x64xf32>
    %261 = arith.cmpf oge, %259, %260 : vector<16x64xf32>
    %cst_193 = arith.constant 2.000000e-01 : f32
    %262 = vector.broadcast %cst_193 : f32 to vector<16x64xf32>
    %263 = arith.mulf %262, %259 : vector<16x64xf32>
    %264 = arith.select %261, %259, %263 : vector<16x64xi1>, vector<16x64xf32>
    %c0_194 = arith.constant 0 : index
    %c128_195 = arith.constant 128 : index
    %265 = vector.load %arg13[%c0_194, %c128_195] : memref<16x401xf32, #tpu.memory_space<vmem>>, vector<16x64xf32>
    tpu.vector_store %arg13[%c0_194, %c128_195], %264 {strides = array<i32>} : memref<16x401xf32, #tpu.memory_space<vmem>>, vector<16x64xf32>,
    %c0_196 = arith.constant 0 : index
    %c119_197 = arith.constant 119 : index
    %266 = vector.load %arg13[%c0_196, %c119_197] : memref<16x401xf32, #tpu.memory_space<vmem>>, vector<16x64xf32>
    %267 = vector.broadcast %177 : vector<1x64xf32> to vector<16x64xf32>
    %268 = arith.mulf %266, %267 : vector<16x64xf32>
    %c0_198 = arith.constant 0 : index
    %c0_199 = arith.constant 0 : index
    %c0_200 = arith.constant 0 : index
    %269 = vector.load %arg7[%c0_198, %c0_199, %c0_200] : memref<9x16x16xf32, #tpu.memory_space<vmem>>, vector<1x16x16xf32>
    %270 = vector.shape_cast %269 : vector<1x16x16xf32> to vector<16x16xf32>
    %cst_201 = arith.constant dense<0.000000e+00> : vector<16x64xf32>
    %271 = tpu.matmul %270, %268, %cst_201 {dimension_numbers = #tpu.dot_dimension_numbers<[1], [0], [0], [1], [0, 0, 1, 1], [], []>} : vector<16x16xf32>, vector<16x64xf32>, vector<16x64xf32> -> vector<16x64xf32>
    %c0_202 = arith.constant 0 : index
    %c120_203 = arith.constant 120 : index
    %272 = vector.load %arg13[%c0_202, %c120_203] : memref<16x401xf32, #tpu.memory_space<vmem>>, vector<16x64xf32>
    %c1_204 = arith.constant 1 : index
    %c0_205 = arith.constant 0 : index
    %c0_206 = arith.constant 0 : index
    %273 = vector.load %arg7[%c1_204, %c0_205, %c0_206] : memref<9x16x16xf32, #tpu.memory_space<vmem>>, vector<1x16x16xf32>
    %274 = vector.shape_cast %273 : vector<1x16x16xf32> to vector<16x16xf32>
    %cst_207 = arith.constant dense<0.000000e+00> : vector<16x64xf32>
    %275 = tpu.matmul %274, %272, %cst_207 {dimension_numbers = #tpu.dot_dimension_numbers<[1], [0], [0], [1], [0, 0, 1, 1], [], []>} : vector<16x16xf32>, vector<16x64xf32>, vector<16x64xf32> -> vector<16x64xf32>
    %276 = arith.addf %271, %275 : vector<16x64xf32>
    %c0_208 = arith.constant 0 : index
    %c121_209 = arith.constant 121 : index
    %277 = vector.load %arg13[%c0_208, %c121_209] : memref<16x401xf32, #tpu.memory_space<vmem>>, vector<16x64xf32>
    %278 = vector.broadcast %178 : vector<1x64xf32> to vector<16x64xf32>
    %279 = arith.mulf %277, %278 : vector<16x64xf32>
    %c2_210 = arith.constant 2 : index
    %c0_211 = arith.constant 0 : index
    %c0_212 = arith.constant 0 : index
    %280 = vector.load %arg7[%c2_210, %c0_211, %c0_212] : memref<9x16x16xf32, #tpu.memory_space<vmem>>, vector<1x16x16xf32>
    %281 = vector.shape_cast %280 : vector<1x16x16xf32> to vector<16x16xf32>
    %cst_213 = arith.constant dense<0.000000e+00> : vector<16x64xf32>
    %282 = tpu.matmul %281, %279, %cst_213 {dimension_numbers = #tpu.dot_dimension_numbers<[1], [0], [0], [1], [0, 0, 1, 1], [], []>} : vector<16x16xf32>, vector<16x64xf32>, vector<16x64xf32> -> vector<16x64xf32>
    %283 = arith.addf %276, %282 : vector<16x64xf32>
    %c0_214 = arith.constant 0 : index
    %c127_215 = arith.constant 127 : index
    %284 = vector.load %arg13[%c0_214, %c127_215] : memref<16x401xf32, #tpu.memory_space<vmem>>, vector<16x64xf32>
    %285 = vector.broadcast %177 : vector<1x64xf32> to vector<16x64xf32>
    %286 = arith.mulf %284, %285 : vector<16x64xf32>
    %c3_216 = arith.constant 3 : index
    %c0_217 = arith.constant 0 : index
    %c0_218 = arith.constant 0 : index
    %287 = vector.load %arg7[%c3_216, %c0_217, %c0_218] : memref<9x16x16xf32, #tpu.memory_space<vmem>>, vector<1x16x16xf32>
    %288 = vector.shape_cast %287 : vector<1x16x16xf32> to vector<16x16xf32>
    %cst_219 = arith.constant dense<0.000000e+00> : vector<16x64xf32>
    %289 = tpu.matmul %288, %286, %cst_219 {dimension_numbers = #tpu.dot_dimension_numbers<[1], [0], [0], [1], [0, 0, 1, 1], [], []>} : vector<16x16xf32>, vector<16x64xf32>, vector<16x64xf32> -> vector<16x64xf32>
    %290 = arith.addf %283, %289 : vector<16x64xf32>
    %c0_220 = arith.constant 0 : index
    %c128_221 = arith.constant 128 : index
    %291 = vector.load %arg13[%c0_220, %c128_221] : memref<16x401xf32, #tpu.memory_space<vmem>>, vector<16x64xf32>
    %c4_222 = arith.constant 4 : index
    %c0_223 = arith.constant 0 : index
    %c0_224 = arith.constant 0 : index
    %292 = vector.load %arg7[%c4_222, %c0_223, %c0_224] : memref<9x16x16xf32, #tpu.memory_space<vmem>>, vector<1x16x16xf32>
    %293 = vector.shape_cast %292 : vector<1x16x16xf32> to vector<16x16xf32>
    %cst_225 = arith.constant dense<0.000000e+00> : vector<16x64xf32>
    %294 = tpu.matmul %293, %291, %cst_225 {dimension_numbers = #tpu.dot_dimension_numbers<[1], [0], [0], [1], [0, 0, 1, 1], [], []>} : vector<16x16xf32>, vector<16x64xf32>, vector<16x64xf32> -> vector<16x64xf32>
    %295 = arith.addf %290, %294 : vector<16x64xf32>
    %c0_226 = arith.constant 0 : index
    %c129_227 = arith.constant 129 : index
    %296 = vector.load %arg13[%c0_226, %c129_227] : memref<16x401xf32, #tpu.memory_space<vmem>>, vector<16x64xf32>
    %297 = vector.broadcast %178 : vector<1x64xf32> to vector<16x64xf32>
    %298 = arith.mulf %296, %297 : vector<16x64xf32>
    %c5_228 = arith.constant 5 : index
    %c0_229 = arith.constant 0 : index
    %c0_230 = arith.constant 0 : index
    %299 = vector.load %arg7[%c5_228, %c0_229, %c0_230] : memref<9x16x16xf32, #tpu.memory_space<vmem>>, vector<1x16x16xf32>
    %300 = vector.shape_cast %299 : vector<1x16x16xf32> to vector<16x16xf32>
    %cst_231 = arith.constant dense<0.000000e+00> : vector<16x64xf32>
    %301 = tpu.matmul %300, %298, %cst_231 {dimension_numbers = #tpu.dot_dimension_numbers<[1], [0], [0], [1], [0, 0, 1, 1], [], []>} : vector<16x16xf32>, vector<16x64xf32>, vector<16x64xf32> -> vector<16x64xf32>
    %302 = arith.addf %295, %301 : vector<16x64xf32>
    %c0_232 = arith.constant 0 : index
    %c135_233 = arith.constant 135 : index
    %303 = vector.load %arg13[%c0_232, %c135_233] : memref<16x401xf32, #tpu.memory_space<vmem>>, vector<16x64xf32>
    %304 = vector.broadcast %177 : vector<1x64xf32> to vector<16x64xf32>
    %305 = arith.mulf %303, %304 : vector<16x64xf32>
    %c6_234 = arith.constant 6 : index
    %c0_235 = arith.constant 0 : index
    %c0_236 = arith.constant 0 : index
    %306 = vector.load %arg7[%c6_234, %c0_235, %c0_236] : memref<9x16x16xf32, #tpu.memory_space<vmem>>, vector<1x16x16xf32>
    %307 = vector.shape_cast %306 : vector<1x16x16xf32> to vector<16x16xf32>
    %cst_237 = arith.constant dense<0.000000e+00> : vector<16x64xf32>
    %308 = tpu.matmul %307, %305, %cst_237 {dimension_numbers = #tpu.dot_dimension_numbers<[1], [0], [0], [1], [0, 0, 1, 1], [], []>} : vector<16x16xf32>, vector<16x64xf32>, vector<16x64xf32> -> vector<16x64xf32>
    %309 = arith.addf %302, %308 : vector<16x64xf32>
    %c0_238 = arith.constant 0 : index
    %c136_239 = arith.constant 136 : index
    %310 = vector.load %arg13[%c0_238, %c136_239] : memref<16x401xf32, #tpu.memory_space<vmem>>, vector<16x64xf32>
    %c7_240 = arith.constant 7 : index
    %c0_241 = arith.constant 0 : index
    %c0_242 = arith.constant 0 : index
    %311 = vector.load %arg7[%c7_240, %c0_241, %c0_242] : memref<9x16x16xf32, #tpu.memory_space<vmem>>, vector<1x16x16xf32>
    %312 = vector.shape_cast %311 : vector<1x16x16xf32> to vector<16x16xf32>
    %cst_243 = arith.constant dense<0.000000e+00> : vector<16x64xf32>
    %313 = tpu.matmul %312, %310, %cst_243 {dimension_numbers = #tpu.dot_dimension_numbers<[1], [0], [0], [1], [0, 0, 1, 1], [], []>} : vector<16x16xf32>, vector<16x64xf32>, vector<16x64xf32> -> vector<16x64xf32>
    %314 = arith.addf %309, %313 : vector<16x64xf32>
    %c0_244 = arith.constant 0 : index
    %c137_245 = arith.constant 137 : index
    %315 = vector.load %arg13[%c0_244, %c137_245] : memref<16x401xf32, #tpu.memory_space<vmem>>, vector<16x64xf32>
    %316 = vector.broadcast %178 : vector<1x64xf32> to vector<16x64xf32>
    %317 = arith.mulf %315, %316 : vector<16x64xf32>
    %c8_246 = arith.constant 8 : index
    %c0_247 = arith.constant 0 : index
    %c0_248 = arith.constant 0 : index
    %318 = vector.load %arg7[%c8_246, %c0_247, %c0_248] : memref<9x16x16xf32, #tpu.memory_space<vmem>>, vector<1x16x16xf32>
    %319 = vector.shape_cast %318 : vector<1x16x16xf32> to vector<16x16xf32>
    %cst_249 = arith.constant dense<0.000000e+00> : vector<16x64xf32>
    %320 = tpu.matmul %319, %317, %cst_249 {dimension_numbers = #tpu.dot_dimension_numbers<[1], [0], [0], [1], [0, 0, 1, 1], [], []>} : vector<16x16xf32>, vector<16x64xf32>, vector<16x64xf32> -> vector<16x64xf32>
    %321 = arith.addf %314, %320 : vector<16x64xf32>
    %cst_250 = arith.constant dense<0.000000e+00> : vector<16xf32>
    %322 = vector.multi_reduction <add>, %321, %cst_250 [1] : vector<16x64xf32> to vector<16xf32>
    %323 = vector.shape_cast %322 : vector<16xf32> to vector<16x1xf32>
    %324 = arith.mulf %321, %321 : vector<16x64xf32>
    %cst_251 = arith.constant dense<0.000000e+00> : vector<16xf32>
    %325 = vector.multi_reduction <add>, %324, %cst_251 [1] : vector<16x64xf32> to vector<16xf32>
    %326 = vector.shape_cast %325 : vector<16xf32> to vector<16x1xf32>
    %cst_252 = arith.constant 1.562500e-02 : f32
    %327 = vector.broadcast %cst_252 : f32 to vector<16x1xf32>
    %328 = arith.mulf %323, %327 : vector<16x1xf32>
    %cst_253 = arith.constant 1.562500e-02 : f32
    %329 = vector.broadcast %cst_253 : f32 to vector<16x1xf32>
    %330 = arith.mulf %326, %329 : vector<16x1xf32>
    %331 = arith.mulf %328, %328 : vector<16x1xf32>
    %332 = arith.subf %330, %331 : vector<16x1xf32>
    %cst_254 = arith.constant 0.000000e+00 : f32
    %333 = vector.broadcast %cst_254 : f32 to vector<16x1xf32>
    %334 = arith.maximumf %332, %333 : vector<16x1xf32>
    %335 = vector.broadcast %328 : vector<16x1xf32> to vector<16x64xf32>
    %336 = arith.subf %321, %335 : vector<16x64xf32>
    %cst_255 = arith.constant 9.99999974E-6 : f32
    %337 = vector.broadcast %cst_255 : f32 to vector<16x1xf32>
    %338 = arith.addf %334, %337 : vector<16x1xf32>
    %339 = math.rsqrt %338 : vector<16x1xf32>
    %340 = vector.broadcast %339 : vector<16x1xf32> to vector<16x64xf32>
    %341 = arith.mulf %336, %340 : vector<16x64xf32>
    %cst_256 = arith.constant 0.000000e+00 : f32
    %342 = vector.broadcast %cst_256 : f32 to vector<16x64xf32>
    %343 = arith.cmpf oge, %341, %342 : vector<16x64xf32>
    %cst_257 = arith.constant 2.000000e-01 : f32
    %344 = vector.broadcast %cst_257 : f32 to vector<16x64xf32>
    %345 = arith.mulf %344, %341 : vector<16x64xf32>
    %346 = arith.select %343, %341, %345 : vector<16x64xi1>, vector<16x64xf32>
    %c0_258 = arith.constant 0 : index
    %c0_259 = arith.constant 0 : index
    %c0_260 = arith.constant 0 : index
    %347 = vector.load %arg11[%c0_258, %c0_259, %c0_260] : memref<1x16x64xf32, #tpu.memory_space<vmem>>, vector<1x16x64xf32>
    %348 = vector.shape_cast %347 : vector<1x16x64xf32> to vector<16x64xf32>
    %349 = vector.shape_cast %346 : vector<16x64xf32> to vector<1x16x64xf32>
    tpu.vector_store %arg11[%c0_258, %c0_259, %c0_260], %349 {strides = array<i32>} : memref<1x16x64xf32, #tpu.memory_space<vmem>>, vector<1x16x64xf32>,
    %c0_261 = arith.constant 0 : index
    %c0_262 = arith.constant 0 : index
    %350 = vector.load %arg8[%c0_261, %c0_262] : memref<64x16xf32, #tpu.memory_space<vmem>>, vector<64x16xf32>
    %cst_263 = arith.constant dense<0.000000e+00> : vector<16x16xf32>
    %351 = tpu.matmul %346, %350, %cst_263 {dimension_numbers = #tpu.dot_dimension_numbers<[1], [0], [0], [1], [0, 0, 1, 1], [], []>} : vector<16x64xf32>, vector<64x16xf32>, vector<16x16xf32> -> vector<16x16xf32>
    %c0_264 = arith.constant 0 : index
    %c0_265 = arith.constant 0 : index
    %c0_266 = arith.constant 0 : index
    %352 = vector.load %arg12[%c0_264, %c0_265, %c0_266] : memref<1x16x16xf32, #tpu.memory_space<vmem>>, vector<1x16x16xf32>
    %353 = vector.shape_cast %352 : vector<1x16x16xf32> to vector<16x16xf32>
    %354 = vector.shape_cast %351 : vector<16x16xf32> to vector<1x16x16xf32>
    tpu.vector_store %arg12[%c0_264, %c0_265, %c0_266], %354 {strides = array<i32>} : memref<1x16x16xf32, #tpu.memory_space<vmem>>, vector<1x16x16xf32>,
    return
  }
  func.func @transform_0(%arg0: i32) -> (i32, i32, i32) {
    %c0_i32 = arith.constant 0 : i32
    %c0_i32_0 = arith.constant 0 : i32
    %c0_i32_1 = arith.constant 0 : i32
    return %arg0, %c0_i32, %c0_i32_0 : i32, i32, i32
  }
  func.func @transform_1(%arg0: i32) -> (i32, i32, i32) {
    %c0_i32 = arith.constant 0 : i32
    %c0_i32_0 = arith.constant 0 : i32
    %c0_i32_1 = arith.constant 0 : i32
    %c0_i32_2 = arith.constant 0 : i32
    return %c0_i32, %c0_i32_0, %c0_i32_1 : i32, i32, i32
  }
  func.func @transform_2(%arg0: i32) -> (i32, i32, i32) {
    %c0_i32 = arith.constant 0 : i32
    %c0_i32_0 = arith.constant 0 : i32
    %c0_i32_1 = arith.constant 0 : i32
    %c0_i32_2 = arith.constant 0 : i32
    return %c0_i32, %c0_i32_0, %c0_i32_1 : i32, i32, i32
  }
  func.func @transform_3(%arg0: i32) -> (i32, i32) {
    %c0_i32 = arith.constant 0 : i32
    %c0_i32_0 = arith.constant 0 : i32
    %c0_i32_1 = arith.constant 0 : i32
    return %c0_i32, %c0_i32_0 : i32, i32
  }
  func.func @transform_4(%arg0: i32) -> (i32, i32) {
    %c0_i32 = arith.constant 0 : i32
    %c0_i32_0 = arith.constant 0 : i32
    %c0_i32_1 = arith.constant 0 : i32
    return %c0_i32, %c0_i32_0 : i32, i32
  }
  func.func @transform_5(%arg0: i32) -> (i32, i32, i32) {
    %c0_i32 = arith.constant 0 : i32
    %c0_i32_0 = arith.constant 0 : i32
    %c0_i32_1 = arith.constant 0 : i32
    %c0_i32_2 = arith.constant 0 : i32
    return %c0_i32, %c0_i32_0, %c0_i32_1 : i32, i32, i32
  }
  func.func @transform_6(%arg0: i32) -> (i32, i32, i32) {
    %c0_i32 = arith.constant 0 : i32
    %c0_i32_0 = arith.constant 0 : i32
    %c0_i32_1 = arith.constant 0 : i32
    %c0_i32_2 = arith.constant 0 : i32
    return %c0_i32, %c0_i32_0, %c0_i32_1 : i32, i32, i32
  }
  func.func @transform_7(%arg0: i32) -> (i32, i32) {
    %c0_i32 = arith.constant 0 : i32
    %c0_i32_0 = arith.constant 0 : i32
    %c0_i32_1 = arith.constant 0 : i32
    return %c0_i32, %c0_i32_0 : i32, i32
  }
  func.func @transform_8(%arg0: i32) -> (i32, i32) {
    %c0_i32 = arith.constant 0 : i32
    %c0_i32_0 = arith.constant 0 : i32
    %c0_i32_1 = arith.constant 0 : i32
    return %c0_i32, %c0_i32_0 : i32, i32
  }
  func.func @transform_9(%arg0: i32) -> (i32, i32, i32) {
    %c0_i32 = arith.constant 0 : i32
    %c0_i32_0 = arith.constant 0 : i32
    %c0_i32_1 = arith.constant 0 : i32
    return %arg0, %c0_i32, %c0_i32_0 : i32, i32, i32
  }
  func.func @transform_10(%arg0: i32) -> (i32, i32, i32) {
    %c0_i32 = arith.constant 0 : i32
    %c0_i32_0 = arith.constant 0 : i32
    %c0_i32_1 = arith.constant 0 : i32
    return %arg0, %c0_i32, %c0_i32_0 : i32, i32, i32
  }
  func.func @transform_11(%arg0: i32) -> (i32, i32, i32) {
    %c0_i32 = arith.constant 0 : i32
    %c0_i32_0 = arith.constant 0 : i32
    %c0_i32_1 = arith.constant 0 : i32
    return %arg0, %c0_i32, %c0_i32_0 : i32, i32, i32
  }
}

</mosaic_0001>

<bundles_post_ra>
// kernel: tpu_custom_call.1
= control target key start
LH: loop header
LB: loop body
LE: loop exit
PB: predicated region body
PF: predicated region fallthrough
CT: control target
= control target key end

     0   :  { %s6033_s0 = inlined_call_operand.vmem [shape: f32[2,4,256], index: 0, kind: input, shape index: {}]   ;;  %s6034_s1 = inlined_call_operand.vmem [shape: f32[9,8,4], index: 1, kind: input, shape index: {}]   ;;  %s6035_s2 = inlined_call_operand.vmem [shape: f32[9,8,8], index: 2, kind: input, shape index: {}]   ;;  %s6036_s3 = inlined_call_operand.vmem [shape: f32[256,64], index: 3, kind: input, shape index: {}]   ;;  %s6037_s4 = inlined_call_operand.vmem [shape: f32[2,256], index: 4, kind: input, shape index: {}]   ;;  %s6038_s5 = inlined_call_operand.vmem [shape: f32[9,16,8], index: 5, kind: input, shape index: {}]   ;;  %s6039_s6 = inlined_call_operand.vmem [shape: f32[9,16,16], index: 6, kind: input, shape index: {}]   ;;  %s6040_s7 = inlined_call_operand.vmem [shape: f32[64,16], index: 7, kind: input, shape index: {}]   ;;  %s6041_s8 = inlined_call_operand.vmem [shape: f32[2,64], index: 8, kind: input, shape index: {}]   ;;  %s6042_s9 = inlined_call_operand.hbm [shape: f32[2,8,256], index: 9, kind: output, shape index: {0}]   ;;  %s6043_s10 = inlined_call_operand.hbm [shape: f32[2,16,64], index: 10, kind: output, shape index: {1}]   ;;  %s6044_s11 = inlined_call_operand.hbm [shape: f32[2,16,16], index: 11, kind: output, shape index: {2}]  }
   0x1   :  { %6067 = sst [smem:[#allocation10_spill]] %s6033_s0 }
   0x2   :  { %6068 = sst [smem:[#allocation11_spill]] %s6034_s1 }
   0x3   :  { %6069 = sst [smem:[#allocation12_spill]] %s6035_s2 }
   0x4   :  { %6070 = sst [smem:[#allocation13_spill]] %s6036_s3 }
   0x5   :  { %6071 = sst [smem:[#allocation14_spill]] %s6037_s4 }
   0x6   :  { %6072 = sst [smem:[#allocation15_spill]] %s6038_s5 }
   0x7   :  { %6073 = sst [smem:[#allocation16_spill]] %s6039_s6 }
   0x8   :  { %17 = vsyncpa [#allocation4], 0 }
   0x9   :  { %19 = vsyncpa [#allocation4 + $0x1], 0 }
   0xa   :  { %20 = vsyncpa [#allocation6], 0 }
   0xb   :  { %22 = vsyncpa [#allocation6 + $0x1], 0  ;;  %s5077_s17 = smov 0   ;;  %s5079_s18 = smov 0  }
   0xc   :  { %s5081_s19 = smov 0   ;;  %s5083_s20 = smov 0  }
   0xd LB: > { %s5098_s21 = sadd.s32 4294967295, %s4996_s20   ;;  %s6045_s22 = sadd.s32 4294967294, %s4996_s20   ;;  %s4996_s20 = sphi %s5083_s20, %s6098_s20   ;;  %s4992_s19 = sphi %s5081_s19, %s6097_s19   ;;  %s4988_s18 = sphi %s5079_s18, %s6096_s18   ;;  %s4984_s17 = sphi %s5077_s17, %s6095_s17  }
   0xe   : > { %s5102_s23 = sadd.s32 1, %s4996_s20   ;;  %s229_s24 = sadd.s32 1, %s4992_s19 }
   0xf   : > { %s226_s25 = ssub.s32 %s4996_s20, %s5102_s23  ;;  %p239_p0 = scmp.ne.s32.totalorder %s4992_s19, %s4988_s18 }
  0x10   : > { %p227_p1 = scmp.eq.s32.totalorder %s226_s25, 0  ;;  %p240_p2 = scmp.eq.s32.totalorder %s5098_s21, 1 }
  0x11   : > { %p245_p3 = scmp.ne.s32.totalorder %s4988_s18, %s4984_s17  ;;  %p246_p4 = scmp.eq.s32.totalorder %s6045_s22, 1 }
  0x12   : > { %s5115_s26 = scalar_select %p227_p1, %s4992_s19, %s229_s24  }
  0x13   : > { %p5117_p5 = por %p240_p2, %p239_p0  ;;  %p5121_p6 = por %p246_p4, %p245_p3 }
  0x14   : > { %p4421_p7 = scmp.ge.s32.totalorder %s4996_s20, 1  ;;  %p348_p8 = scmp.lt.s32.totalorder %s4996_s20, 3 }
  0x16   : > { %p349_p9 = pnand %p4421_p7, %p348_p8 }
  0x17   : > { %s6076_s4 = sld [smem:[#allocation14_spill]] (!%p349_p9)  ;;  %p398_p10 = scmp.lt.s32.totalorder (!%p349_p9), %s5098_s21, 1 }
  0x18   : > { %352 = sbr.rel (%p349_p9) target bundleno = 2663 (0xa67), region = 56  ;;  %s4999_s16 = smov (!%p349_p9), 113  }
  0x19   : > { %s6046_s24 = smov (!%p349_p9), 111   ;;  %s6077_s0 = sld [smem:[#allocation10_spill]] (!%p349_p9) }
  0x1a   : > { %s6052_s12 = smov (!%p349_p9), 127   ;;  %s6050_s13 = smov (!%p349_p9), 1  }
  0x1b   : > { %s5005_s25 = smov (!%p349_p9), 16   ;;  %s6078_s1 = sld [smem:[#allocation11_spill]] (!%p349_p9) }
  0x1c   : > { %s6048_s29 = smov (!%p349_p9), 112   ;;  %s6081_s2 = sld [smem:[#allocation12_spill]] (!%p349_p9) }
  0x1d   : > { %v420_v0 = vlaneseq  ;;  %vm407_vm0 = vcmask 1048440   ;;  %v4427_v1 = vld [vmem:[%s6076_s4 + $0x1] ss:$2 sm:$0x3]  ;;  %v4998_v3 = vmov 0.0   ;;  %vm409_vm1 = vcmask 138240  }
  0x1e   : > { %408 = vst.msk [vmem:[#allocation2] sm:$0xff] %vm407_vm0, %v4998_v3  ;;  %528 = vmatprep.mubr.f32.mxu1 %v4998_v3  ;;  %918 = vmatprep.mubr.f32.mxu0 %v4998_v3  ;;  %v404_v4 = vld [vmem:[%s6076_s4] ss:$2 sm:$0x3]  ;;  %s399_s14 = scalar_select %p398_p10, %s5098_s21, 1  ;;  %vm459_vm2 = vcmask 1043456  }
  0x1f   : > { %v421_v2 = vshrl.u32 %v420_v0, 7  ;;  %410 = vst.msk [vmem:[#allocation2 + $0x18] sm:$0xff] %vm409_vm1, %v4998_v3  ;;  %vm432_vm3 = vcmask 908288   ;;  %vm637_vm4 = vcmask 924672   ;;  %vm452_vm5 = vcmask 130048   ;;  %s6082_s3 = sld [smem:[#allocation13_spill]] }
  0x20   : > { %s4563_s15 = sshll.u32 %s399_s14, 3  ;;  %s5003_s14 = smov 15   ;;  %vm743_vm6 = vcmask 1039360   ;;  %vm455_vm7 = vcmask 31744   ;;  %vm656_vm8 = vcmask 121856   ;;  %vm762_vm9 = vcmask 7168  }
  0x21   : > { %v422_v5 = vsub.s32 0, %v421_v2  ;;  %v426_v6 = vsub.s32 1, %v421_v2  ;;  %s402_s30 = scalar_lea.vmem %s6077_s0, %s4563_s15  ;;  %s5004_s15 = smov 17   ;;  %v4443_v43 = vld [vmem:[%s6078_s1 + $0x20] sm:$0xff]  ;;  %v4428_v52 = vld [vmem:[%s6078_s1 + $0x8] sm:$0xff]  ;;  %vm1149_vm10 = vcmask 916480  }
  0x22   : > { %v403_v11 = vld [vmem:[%s402_s30] sm:$0xff]  ;;  %vm2320_vm11 = vcmask 1048504   ;;  %vm1385_vm14 = vcmask 64512   ;;  %s6083_s22 = smov 127   ;;  %s6084_s30 = smov 1  }
  0x23   : > { %v628_v7 = vrot.slane %v4427_v1, %v422_v5  ;;  %v423_v8 = vrot.slane %v404_v4, %v422_v5  ;;  %v632_v9 = vrot.slane %v4427_v1, %v426_v6  ;;  %v427_v10 = vrot.slane %v404_v4, %v426_v6  ;;  %414 = vst [vmem:[#allocation2 + $0x8] sm:$0xf] %v403_v11  ;;  %s6085_s5 = sld [smem:[#allocation15_spill]]  ;;  %s5013_s0 = smov [#allocation5]  }
  0x24   : > { %v412_v12 = vcombine.high %v403_v11, %v403_v11  ;;  %2322 = vst.msk [vmem:[#allocation2 + $0x20] sm:$0xff] %vm2320_vm11, %v4998_v3  ;;  %s6090_s6 = sld [smem:[#allocation16_spill]] }
  0x25   : > { %633 = vrot.lane.b32.xlu1 %v628_v7, %s4999_s16  ;;  %428 = vrot.lane.b32.xlu0 %v423_v8, %s6046_s24  ;;  %v416_v15 = vld [vmem:[#allocation2] sm:$0xf] }
  0x26   : > { %415 = vst [vmem:[#allocation2 + $0x10] sm:$0xf] %v412_v12  ;;  %v5184_v27 = vld [vmem:[#allocation2 + $0x18] sm:$0xf]  ;;  %v440_v12 = vld [vmem:[%s6078_s1] sm:$0xff] }
  0x29   : > { %635 = vrot.lane.b32.xlu1 %v632_v9, %s4999_s16  ;;  %430 = vrot.lane.b32.xlu0 %v427_v10, %s6046_s24 }
  0x2a   : > { %v5155_v13 = vld [vmem:[#allocation2 + $0x8] sm:$0xf] }
  0x2b   : > { %v927_v32 = vld [vmem:[#allocation2 + $0x8] sm:$0xf] }
  0x2d   : > { %741 = vrot.lane.b32.xlu1 %v427_v10, %s6052_s12  ;;  %739 = vrot.lane.b32.xlu0 %v423_v8, %s6052_s12  ;;  %v418_v14 = vld [vmem:[#allocation2 + $0x10] sm:$0xf] }
  0x2e   : > { %4444 = vmatprep.subr.msk.mxu0 %vm459_vm2, %v418_v14  ;;  %v928_v53 = vld [vmem:[#allocation2 + $0x10] sm:$0xf] }
  0x2f   : > { %4445 = vmatpush1.msk.msra.mxu0 %vm459_vm2, %v5155_v13 }
  0x30   : > { %4446 = vmatmul.mubr.msk.f32.vlgmr.msra.gmra.mxu0 %vm455_vm7, %v4443_v43  ;;  %v4447_v43 = vld [vmem:[%s6078_s1 + $0x28] sm:$0xff] }
  0x31   : > { %932 = vrot.lane.b32.xlu1 %v632_v9, %s6050_s13  ;;  %930 = vrot.lane.b32.xlu0 %v628_v7, %s6050_s13 }
  0x32   : > { %1129 = vmatprep.mubr.f32.mxu0 %v4998_v3 }
  0x35   : > { %1034 = vrot.lane.b32.xlu0 %v423_v8, %s5003_s14  ;;  %1036 = vrot.lane.b32.xlu1 %v427_v10, %s5003_s14 }
  0x39   : > { %1234 = vrot.lane.b32.xlu1 %v632_v9, %s5004_s15  ;;  %1232 = vrot.lane.b32.xlu0 %v628_v7, %s5004_s15 }
  0x3d   : > { %448 = vrot.lane.b32.xlu0 %v5155_v13, %s5005_s25  ;;  %450 = vrot.lane.b32.xlu1 %v418_v14, %s5005_s25 }
  0x41   : > { %446 = vrot.lane.b32.xlu0 %v416_v15, %s5005_s25 }
  0x97   : > { %v5164_v16 = vpop.permute.xlu1 %633  ;;  %v5166_v17 = vpop.permute.xlu0 %428 }
  0x98   : > { %v437_v18 = vmul.f32 %v5166_v17, %v416_v15  ;;  %v642_v26 = vmul.f32 %v5164_v16, %v416_v15 }
  0x9a   : > { %538 = vrot.lane.b32.xlu1 %v437_v18, %s5004_s15 }
  0x9b   : > { %v5170_v19 = vpop.permute.xlu1 %635  ;;  %v5172_v20 = vpop.permute.xlu0 %430 }
  0x9c   : > { %v644_v21 = vmul.f32 %v5170_v19, %v418_v14  ;;  %v439_v22 = vmul.f32 %v5172_v20, %v418_v14  ;;  %v5206_v37 = vsel %vm432_vm3, %v5166_v17, %v5172_v20  ;;  %v5221_v42 = vsel %vm637_vm4, %v5164_v16, %v5170_v19 }
  0x9d   : > { %v438_v41 = vmul.f32 %v5206_v37, %v5155_v13  ;;  %v643_v46 = vmul.f32 %v5221_v42, %v5155_v13 }
  0x9e   : > { %654 = vrot.lane.b32.xlu1 %v644_v21, %s5003_s14  ;;  %542 = vrot.lane.b32.xlu0 %v439_v22, %s5004_s15  ;;  %v4435_v21 = vld [vmem:[%s6078_s1 + $0x10] sm:$0xff] }
  0x9f   : > { %v5178_v23 = vpop.permute.xlu1 %741  ;;  %v5180_v24 = vpop.permute.xlu0 %739 }
  0xa0   : > { %v748_v25 = vmul.f32 %v5180_v24, %v416_v15  ;;  %v750_v31 = vmul.f32 %v5178_v23, %v418_v14  ;;  %v5236_v48 = vsel %vm743_vm6, %v5180_v24, %v5178_v23 }
  0xa1   : > { %v749_v50 = vmul.f32 %v5236_v48, %v5155_v13 }
  0xa2   : > { %756 = vrot.lane.b32.xlu1 %v748_v25, %s6050_s13  ;;  %650 = vrot.lane.b32.xlu0 %v642_v26, %s5003_s14 }
  0xa3   : > { %v5188_v28 = vpop.permute.xlu1 %932  ;;  %v5190_v29 = vpop.permute.xlu0 %930 }
  0xa4   : > { %v940_v30 = vmul.f32 %v5188_v28, %v5184_v27  ;;  %v938_v36 = vmul.f32 %v5190_v29, %v927_v32  ;;  %v5256_v55 = vsel %vm762_vm9, %v5190_v29, %v5188_v28 }
  0xa5   : > { %v939_v58 = vmul.f32 %v5256_v55, %v928_v53 }
  0xa6   : > { %950 = vrot.lane.b32.xlu1 %v940_v30, %s6052_s12  ;;  %760 = vrot.lane.b32.xlu0 %v750_v31, %s6050_s13  ;;  %v4439_v30 = vld [vmem:[%s6078_s1 + $0x18] sm:$0xff] }
  0xa7   : > { %v5197_v33 = vpop.permute.xlu0 %1034  ;;  %v5199_v34 = vpop.permute.xlu1 %1036 }
  0xa8   : > { %v1042_v35 = vmul.f32 %v5197_v33, %v927_v32  ;;  %v1044_v38 = vmul.f32 %v5199_v34, %v5184_v27  ;;  %v5251_v54 = vsel %vm656_vm8, %v5197_v33, %v5199_v34 }
  0xa9   : > { %v1043_v57 = vmul.f32 %v5251_v54, %v928_v53 }
  0xaa   : > { %1050 = vrot.lane.b32.xlu1 %v1042_v35, %s4999_s16  ;;  %946 = vrot.lane.b32.xlu0 %v938_v36, %s6052_s12 }
  0xab   : > { %v5212_v39 = vpop.permute.xlu1 %1234  ;;  %v5214_v40 = vpop.permute.xlu0 %1232 }
  0xac   : > { %v5264_v56 = vsel %vm409_vm1, %v5214_v40, %v5212_v39  ;;  %v1240_v60 = vmul.f32 %v5214_v40, %v927_v32  ;;  %v1242_v61 = vmul.f32 %v5212_v39, %v5184_v27 }
  0xad   : > { %v1241_v59 = vmul.f32 %v5264_v56, %v928_v53 }
  0xae   : > { %540 = vrot.lane.b32.xlu1 %v438_v41, %s5004_s15  ;;  %1054 = vrot.lane.b32.xlu0 %v1044_v38, %s4999_s16 }
  0xaf   : > { %v449_v44 = vpop.permute.xlu0 %448  ;;  %v451_v45 = vpop.permute.xlu1 %450 }
  0xb0   : > { %v454_v47 = vsel %vm452_vm5, %v449_v44, %v451_v45 }
  0xb1   : > { %4429 = vmatprep.subr.msk.mxu1 %vm459_vm2, %v454_v47 }
  0xb2   : > { %1147 = vrot.lane.b32.xlu1 %v5184_v27, %s6048_s29  ;;  %652 = vrot.lane.b32.xlu0 %v643_v46, %s5003_s14 }
  0xb3   : > { %v447_v49 = vpop.permute.xlu0 %446 }
  0xb4   : > { %v453_v51 = vsel %vm452_vm5, %v447_v49, %v449_v44  ;;  %v4451_v44 = vld [vmem:[%s6078_s1 + $0x30] sm:$0xff] }
  0xb5   : > { %4430 = vmatpush1.msk.msra.mxu1 %vm459_vm2, %v453_v51 }
  0xb6   : > { %758 = vrot.lane.b32.xlu1 %v749_v50, %s6050_s13  ;;  %1145 = vrot.lane.b32.xlu0 %v928_v53, %s6048_s29  ;;  %v4455_v50 = vld [vmem:[%s6078_s1 + $0x38] sm:$0xff] }
  0xb7   : > { %4431 = vmatmul.mubr.msk.f32.vlgmr.msra.gmra.mxu1 %vm455_vm7, %v4428_v52 }
  0xb8   : > { %617 = vmatprep.mubr.f32.mxu1 %v4998_v3 }
  0xba   : > { %1052 = vrot.lane.b32.xlu1 %v1043_v57, %s4999_s16  ;;  %948 = vrot.lane.b32.xlu0 %v939_v58, %s6052_s12  ;;  %v4459_v58 = vld [vmem:[%s6078_s1 + $0x40] sm:$0xff] }
  0xbe   : > { %1250 = vrot.lane.b32.xlu1 %v1241_v59, %s6046_s24  ;;  %1143 = vrot.lane.b32.xlu0 %v927_v32, %s6048_s29  ;;  %v1363_v59 = vld [vmem:[#allocation2] sm:$0xff]  ;;  %s6065_s29 = smov 121  }
  0xbf   : > { %2321 = vst.msk [vmem:[#allocation2] sm:$0xff] %vm2320_vm11, %v4998_v3 }
  0xc2   : > { %1248 = vrot.lane.b32.xlu1 %v1240_v60, %s6046_s24  ;;  %1252 = vrot.lane.b32.xlu0 %v1242_v61, %s6046_s24  ;;  %s6079_s24 = smov 112  }
 0x10c   : > { %v539_v62 = vpop.permute.xlu1 %538 }
 0x110   : > { %v655_v63 = vpop.permute.xlu1 %654  ;;  %v543_v0 = vpop.permute.xlu0 %542 }
 0x114   : > { %v757_v1 = vpop.permute.xlu1 %756  ;;  %v651_v2 = vpop.permute.xlu0 %650 }
 0x118   : > { %v951_v4 = vpop.permute.xlu1 %950  ;;  %v761_v5 = vpop.permute.xlu0 %760 }
 0x11c   : > { %v1051_v6 = vpop.permute.xlu1 %1050  ;;  %v947_v7 = vpop.permute.xlu0 %946 }
 0x120   : > { %v541_v8 = vpop.permute.xlu1 %540  ;;  %v1055_v9 = vpop.permute.xlu0 %1054 }
 0x121   : > { %v544_v10 = vsel %vm409_vm1, %v539_v62, %v541_v8  ;;  %v545_v11 = vsel %vm409_vm1, %v541_v8, %v543_v0 }
 0x122   : > { %4432 = vmatprep.subr.msk.mxu1 %vm459_vm2, %v545_v11 }
 0x123   : > { %4433 = vmatpush1.msk.msra.mxu1 %vm459_vm2, %v544_v10 }
 0x124   : > { %v1148_v13 = vpop.permute.xlu1 %1147  ;;  %4434 = vmatmul.mubr.msk.f32.vlgmr.msra.gmra.mxu1 %vm455_vm7, %v440_v12  ;;  %v653_v14 = vpop.permute.xlu0 %652 }
 0x125   : > { %v657_v15 = vsel %vm656_vm8, %v651_v2, %v653_v14  ;;  %v658_v18 = vsel %vm656_vm8, %v653_v14, %v655_v63  ;;  %730 = vmatprep.mubr.f32.mxu1 %v4998_v3  ;;  %v920_v2 = vpop.f32.mrf.mxu0 }
 0x126   : > { %4436 = vmatprep.subr.msk.mxu1 %vm459_vm2, %v658_v18 }
 0x127   : > { %4437 = vmatpush1.msk.msra.mxu1 %vm459_vm2, %v657_v15  ;;  %v922_v10 = vpop.f32.mrf.mxu0 }
 0x128   : > { %v759_v22 = vpop.permute.xlu1 %758  ;;  %4438 = vmatmul.mubr.msk.f32.vlgmr.msra.gmra.mxu1 %vm455_vm7, %v4435_v21  ;;  %v1146_v25 = vpop.permute.xlu0 %1145 }
 0x129   : > { %v763_v26 = vsel %vm762_vm9, %v757_v1, %v759_v22  ;;  %v764_v27 = vsel %vm762_vm9, %v759_v22, %v761_v5  ;;  %836 = vmatprep.mubr.f32.mxu1 %v4998_v3  ;;  %v1151_v45 = vsel %vm1149_vm10, %v1146_v25, %v1148_v13 }
 0x12a   : > { %4440 = vmatprep.subr.msk.mxu1 %vm459_vm2, %v764_v27 }
 0x12b   : > { %4441 = vmatpush1.msk.msra.mxu1 %vm459_vm2, %v763_v26 }
 0x12c   : > { %v1053_v31 = vpop.permute.xlu1 %1052  ;;  %4442 = vmatmul.mubr.msk.f32.vlgmr.msra.gmra.mxu1 %vm455_vm7, %v4439_v30  ;;  %v949_v32 = vpop.permute.xlu0 %948 }
 0x12d   : > { %v1056_v35 = vsel %vm637_vm4, %v1051_v6, %v1053_v31  ;;  %v1057_v36 = vsel %vm637_vm4, %v1053_v31, %v1055_v9  ;;  %v952_v38 = vsel %vm743_vm6, %v947_v7, %v949_v32  ;;  %v953_v41 = vsel %vm743_vm6, %v949_v32, %v951_v4  ;;  %1025 = vmatprep.mubr.f32.mxu1 %v4998_v3 }
 0x12e   : > { %4448 = vmatprep.subr.msk.mxu1 %vm459_vm2, %v953_v41  ;;  %4452 = vmatprep.subr.msk.mxu0 %vm459_vm2, %v1057_v36 }
 0x12f   : > { %4449 = vmatpush1.msk.msra.mxu1 %vm459_vm2, %v952_v38  ;;  %4453 = vmatpush1.msk.msra.mxu0 %vm459_vm2, %v1056_v35 }
 0x130   : > { %v1251_v46 = vpop.permute.xlu1 %1250  ;;  %4450 = vmatmul.mubr.msk.f32.vlgmr.msra.gmra.mxu1 %vm455_vm7, %v4447_v43  ;;  %4456 = vmatprep.subr.msk.mxu1 %vm459_vm2, %v1151_v45  ;;  %v1144_v47 = vpop.permute.xlu0 %1143 }
 0x131   : > { %v1150_v49 = vsel %vm1149_vm10, %v1144_v47, %v1146_v25  ;;  %4454 = vmatmul.mubr.msk.f32.vlgmr.msra.gmra.mxu0 %vm455_vm7, %v4451_v44  ;;  %1223 = vmatprep.mubr.f32.mxu1 %v4998_v3 }
 0x132   : > { %4457 = vmatpush1.msk.msra.mxu1 %vm459_vm2, %v1150_v49  ;;  %1327 = vmatprep.mubr.f32.mxu0 %v4998_v3 }
 0x134   : > { %v1249_v51 = vpop.permute.xlu1 %1248  ;;  %4458 = vmatmul.mubr.msk.f32.vlgmr.msra.gmra.mxu1 %vm455_vm7, %v4455_v50  ;;  %v1253_v52 = vpop.permute.xlu0 %1252  ;;  %v1366_v50 = vmul.f32 %v1363_v59, %v5166_v17 }
 0x135   : > { %v1254_v53 = vsel %vm432_vm3, %v1249_v51, %v1251_v46  ;;  %v1255_v57 = vsel %vm432_vm3, %v1251_v46, %v1253_v52  ;;  %1453 = vmatprep.mubr.f32.mxu1 %v4998_v3  ;;  %v1641_v51 = vmul.f32 %v1363_v59, %v5180_v24  ;;  %v1815_v52 = vld [vmem:[#allocation2 + $0x18] sm:$0xff] }
 0x136   : > { %4460 = vmatprep.subr.msk.mxu0 %vm459_vm2, %v1255_v57  ;;  %v1818_v57 = vmul.f32 %v1815_v52, %v5188_v28 }
 0x137   : > { %4461 = vmatpush1.msk.msra.mxu0 %vm459_vm2, %v1254_v53  ;;  %v1547_v53 = vmul.f32 %v1363_v59, %v5164_v16  ;;  %vm2326_vm2 = vcmask 523264  }
 0x138   : > { %4462 = vmatmul.mubr.msk.f32.vlgmr.msra.gmra.mxu0 %vm455_vm7, %v4459_v58  ;;  %v1912_v58 = vmul.f32 %v1815_v52, %v5199_v34 }
 0x139   : > { %1540 = vmatprep.mubr.f32.mxu0 %v4998_v3 }
 0x177   : > { %v530_v60 = vpop.f32.mrf.mxu1 }
 0x179   : > { %v532_v61 = vpop.f32.mrf.mxu1 }
 0x1e4   : > { %v619_v62 = vpop.f32.mrf.mxu1 }
 0x1e5   : > { %v620_v1 = vadd.f32 %v619_v62, %v530_v60 }
 0x1e6   : > { %v621_v63 = vpop.f32.mrf.mxu1 }
 0x1e7   : > { %v622_v5 = vadd.f32 %v621_v63, %v532_v61 }
 0x1e8   : > { %v732_v0 = vpop.f32.mrf.mxu1 }
 0x1e9   : > { %v737_v6 = vadd.f32 %v732_v0, %v620_v1 }
 0x1ea   : > { %v734_v4 = vpop.f32.mrf.mxu1 }
 0x1eb   : > { %v738_v8 = vadd.f32 %v734_v4, %v622_v5 }
 0x1ec   : > { %v838_v7 = vpop.f32.mrf.mxu1 }
 0x1ed   : > { %v843_v9 = vadd.f32 %v838_v7, %v737_v6 }
 0x1ee   : > { %v840_v11 = vpop.f32.mrf.mxu1 }
 0x1ef   : > { %v844_v12 = vadd.f32 %v840_v11, %v738_v8  ;;  %v925_v13 = vadd.f32 %v920_v2, %v843_v9 }
 0x1f0   : > { %v1027_v14 = vpop.f32.mrf.mxu1 }
 0x1f1   : > { %v926_v15 = vadd.f32 %v922_v10, %v844_v12  ;;  %v1032_v18 = vadd.f32 %v1027_v14, %v925_v13  ;;  %v1131_v21 = vpop.f32.mrf.mxu0 }
 0x1f2   : > { %v1029_v22 = vpop.f32.mrf.mxu1 }
 0x1f3   : > { %v1033_v25 = vadd.f32 %v1029_v22, %v926_v15  ;;  %v1136_v26 = vadd.f32 %v1131_v21, %v1032_v18  ;;  %v1133_v27 = vpop.f32.mrf.mxu0 }
 0x1f4   : > { %v1225_v30 = vpop.f32.mrf.mxu1 }
 0x1f5   : > { %v1137_v31 = vadd.f32 %v1133_v27, %v1033_v25  ;;  %v1230_v35 = vadd.f32 %v1225_v30, %v1136_v26 }
 0x1f6   : > { %v1227_v32 = vpop.f32.mrf.mxu1 }
 0x1f7   : > { %v1231_v38 = vadd.f32 %v1227_v32, %v1137_v31 }
 0x1f8   : > { %v1329_v36 = vpop.f32.mrf.mxu0 }
 0x1f9   : > { %v1334_v41 = vadd.f32 %v1329_v36, %v1230_v35  ;;  %v1369_v35 = vld [vmem:[%s6081_s2] sm:$0xff] }
 0x1fa   : > { %v1331_v43 = vpop.f32.mrf.mxu0 }
 0x1fb   : > { %v1335_v44 = vadd.f32 %v1331_v43, %v1231_v38  ;;  %v1339_v46 = vmul.f32 %v1334_v41, %v1334_v41 }
 0x1fd   : > { %v1336_v45 = vadd.f32 %v1335_v44, %v1334_v41  ;;  %v1340_v47 = vmul.f32 %v1335_v44, %v1335_v44 }
 0x1ff   : > { %1337 = vadd.xlane.f32.xlu0 %v1336_v45  ;;  %v1341_v49 = vadd.f32 %v1340_v47, %v1339_v46  ;;  %v4466_v45 = vld [vmem:[%s6081_s2 + $0x10] sm:$0xff] }
 0x201   : > { %1342 = vadd.xlane.f32.xlu1 %v1341_v49 }
 0x212   : > { %1463 = vrot.lane.b32.xlu1 %v1366_v50, %s5004_s15 }
 0x215   : > { %1375 = vrot.lane.b32.xlu0 %v1363_v59, %s5005_s25 }
 0x216   : > { %1649 = vrot.lane.b32.xlu1 %v1641_v51, %s6050_s13  ;;  %v4468_v51 = vld [vmem:[%s6081_s2 + $0x18] sm:$0xff] }
 0x219   : > { %1555 = vrot.lane.b32.xlu0 %v1547_v53, %s5003_s14 }
 0x21a   : > { %1828 = vrot.lane.b32.xlu1 %v1818_v57, %s6052_s12 }
 0x21d   : > { %1922 = vrot.lane.b32.xlu0 %v1912_v58, %s4999_s16 }
 0x21e   : > { %2013 = vrot.lane.b32.xlu1 %v1815_v52, %s6079_s24 }
 0x288   : > { %v1338_v17 = vpop.xlane.xlu0 %1337 }
 0x289   : > { %v1344_v24 = vmul.f32 0.00390625, %v1338_v17 }
 0x28a   : > { %v1343_v60 = vpop.xlane.xlu1 %1342 }
 0x28b   : > { %v1345_v61 = vmul.f32 0.00390625, %v1343_v60  ;;  %v1346_v62 = vmul.f32 %v1344_v24, %v1344_v24  ;;  %v1349_v28 = vsub.f32 %v1334_v41, %v1344_v24  ;;  %v1350_v59 = vsub.f32 %v1335_v44, %v1344_v24  ;;  %v4474_v60 = vld [vmem:[%s6081_s2 + $0x30] sm:$0xff] }
 0x28c   : > { %v1376_v12 = vpop.permute.xlu0 %1375 }
 0x28d   : > { %v1347_v63 = vsub.f32 %v1345_v61, %v1346_v62  ;;  %v4472_v62 = vld [vmem:[%s6081_s2 + $0x28] sm:$0xff] }
 0x28f   : > { %v1348_v0 = vmax.f32 %v1347_v63, 0.0 }
 0x291   : > { %v1351_v16 = vadd.f32 1e-05, %v1348_v0 }
 0x293   : > { %4868 = vrsqrt.f32 %v1351_v16 }
 0x2a0   : > { %v4869_v1 = vpop.eup %4868 }
 0x2a1   : > { %v1353_v2 = vmul.f32 %v4869_v1, %v1349_v28  ;;  %v1354_v4 = vmul.f32 %v4869_v1, %v1350_v59  ;;  %v4476_v59 = vld [vmem:[%s6081_s2 + $0x38] sm:$0xff] }
 0x2a3   : > { %vm1355_vm12 = vcmp.ge.f32.partialorder %v1353_v2, 0.0  ;;  %vm1356_vm13 = vcmp.ge.f32.partialorder %v1354_v4, 0.0  ;;  %v1357_v34 = vmul.f32 0.2, %v1353_v2  ;;  %v1358_v5 = vmul.f32 0.2, %v1354_v4 }
 0x2a5   : > { %v5357_v6 = vsel %vm1355_vm12, %v1353_v2, %v1357_v34  ;;  %v5359_v7 = vsel %vm1356_vm13, %v1354_v4, %v1358_v5  ;;  %v4478_v5 = vld [vmem:[%s6081_s2 + $0x40] sm:$0xff] }
 0x2a6   : > { %1361 = vst [vmem:[#allocation2 + $0x8] sm:$0xff] %v5357_v6  ;;  %1362 = vst [vmem:[#allocation2 + $0x10] sm:$0xff] %v5359_v7  ;;  %1379 = vrot.lane.b32.xlu1 %v5359_v7, %s5005_s25  ;;  %1377 = vrot.lane.b32.xlu0 %v5357_v6, %s5005_s25  ;;  %v1367_v8 = vmul.f32 %v5357_v6, %v5206_v37  ;;  %v1368_v9 = vmul.f32 %v5359_v7, %v5172_v20  ;;  %s6055_s25 = smov 119  }
 0x2a7   : > { %v1549_v10 = vmul.f32 %v5359_v7, %v5170_v19  ;;  %v1548_v11 = vmul.f32 %v5357_v6, %v5221_v42  ;;  %v1642_v37 = vmul.f32 %v5357_v6, %v5236_v48  ;;  %v1643_v20 = vmul.f32 %v5359_v7, %v5178_v23 }
 0x2a8   : > { %v1911_v19 = vmul.f32 %v5359_v7, %v5251_v54  ;;  %v1817_v42 = vmul.f32 %v5359_v7, %v5256_v55  ;;  %v1910_v48 = vmul.f32 %v5357_v6, %v5197_v33  ;;  %v1816_v23 = vmul.f32 %v5357_v6, %v5190_v29  ;;  %v1464_v29 = vpop.permute.xlu1 %1463 }
 0x2a9   : > { %v2096_v54 = vmul.f32 %v5359_v7, %v5264_v56  ;;  %v2095_v55 = vmul.f32 %v5357_v6, %v5214_v40  ;;  %v2097_v33 = vmul.f32 %v1815_v52, %v5212_v39  ;;  %v1556_v56 = vpop.permute.xlu0 %1555  ;;  %v4463_v39 = vld [vmem:[%s6081_s2 + $0x8] sm:$0xff]  ;;  %v4470_v52 = vld [vmem:[%s6081_s2 + $0x20] sm:$0xff]  ;;  %s6091_s2 = smov 120  }
 0x2aa   : > { %2011 = vrot.lane.b32.xlu0 %v5359_v7, %s6079_s24  ;;  %1465 = vrot.lane.b32.xlu1 %v1367_v8, %s5004_s15  ;;  %v2231_v8 = vld [vmem:[%s6082_s3 + $0x78] sm:$0xff] }
 0x2ac   : > { %v1650_v13 = vpop.permute.xlu1 %1649 }
 0x2ad   : > { %v1923_v18 = vpop.permute.xlu0 %1922 }
 0x2ae   : > { %1467 = vrot.lane.b32.xlu0 %v1368_v9, %s5004_s15  ;;  %1559 = vrot.lane.b32.xlu1 %v1549_v10, %s5003_s14 }
 0x2b0   : > { %v1829_v14 = vpop.permute.xlu1 %1828 }
 0x2b2   : > { %1557 = vrot.lane.b32.xlu0 %v1548_v11, %s5003_s14  ;;  %1651 = vrot.lane.b32.xlu1 %v1642_v37, %s6050_s13  ;;  %s6080_s14 = smov 111  }
 0x2b4   : > { %v5409_v15 = vpop.permute.xlu1 %2013 }
 0x2b6   : > { %1653 = vrot.lane.b32.xlu0 %v1643_v20, %s6050_s13  ;;  %1920 = vrot.lane.b32.xlu1 %v1911_v19, %s4999_s16  ;;  %s6061_s13 = smov 9  }
 0x2ba   : > { %1826 = vrot.lane.b32.xlu0 %v1817_v42, %s6052_s12  ;;  %1918 = vrot.lane.b32.xlu1 %v1910_v48, %s4999_s16 }
 0x2be   : > { %1824 = vrot.lane.b32.xlu0 %v1816_v23, %s6052_s12  ;;  %2105 = vrot.lane.b32.xlu1 %v2096_v54, %s6080_s14  ;;  %s6059_s12 = smov 7  }
 0x2c2   : > { %2009 = vrot.lane.b32.xlu0 %v5357_v6, %s6079_s24  ;;  %2103 = vrot.lane.b32.xlu1 %v2095_v55, %s6080_s14  ;;  %s6063_s24 = smov 8  }
 0x2c6   : > { %2107 = vrot.lane.b32.xlu0 %v2097_v33, %s6080_s14  ;;  %s6054_s14 = sand.u32 1, %s4988_s18  }
 0x2c7   : > { %s5600_s16 = sshll.u32 %s6054_s14, 4  ;;  %s6088_s14 = smov 9  }
 0x2c8   : > { %s5603_s15 = scalar_lea.vmem [#allocation3], %s5600_s16 }
 0x318   : > { %v1380_v21 = vpop.permute.xlu1 %1379  ;;  %v1378_v22 = vpop.permute.xlu0 %1377 }
 0x319   : > { %v1381_v40 = vsel %vm452_vm5, %v1376_v12, %v1378_v22  ;;  %v1382_v25 = vsel %vm452_vm5, %v1378_v22, %v1380_v21 }
 0x31a   : > { %1419 = vmatprep.subr.mxu1 %v1382_v25 }
 0x31b   : > { %1420 = vmatpush1.msra.mxu1 %v1381_v40 }
 0x31c   : > { %v1466_v26 = vpop.permute.xlu1 %1465  ;;  %v2012_v27 = vpop.permute.xlu0 %2011  ;;  %4464 = vmatmul.mubr.msk.f32.vlgmr.msra.gmra.mxu1 %vm1385_vm14, %v4463_v39 }
 0x31d   : > { %1632 = vmatprep.mubr.f32.mxu1 %v4998_v3  ;;  %v1469_v36 = vsel %vm409_vm1, %v1464_v29, %v1466_v26  ;;  %v2016_v16 = vsel %vm1149_vm10, %v2012_v27, %v5409_v15 }
 0x320   : > { %v1560_v30 = vpop.permute.xlu1 %1559  ;;  %v1468_v31 = vpop.permute.xlu0 %1467 }
 0x321   : > { %v1470_v32 = vsel %vm409_vm1, %v1466_v26, %v1468_v31  ;;  %vm2323_vm1 = vcmask 597504  }
 0x322   : > { %1506 = vmatprep.subr.mxu0 %v1470_v32  ;;  %2324 = vst.msk [vmem:[#allocation2 + $0x8] sm:$0xff] %vm2323_vm1, %v4998_v3  ;;  %2325 = vst.msk [vmem:[#allocation2 + $0x28] sm:$0xff] %vm2323_vm1, %v4998_v3 }
 0x323   : > { %1507 = vmatpush1.msra.mxu0 %v1469_v36 }
 0x324   : > { %v1652_v38 = vpop.permute.xlu1 %1651  ;;  %v1558_v41 = vpop.permute.xlu0 %1557  ;;  %4465 = vmatmul.mubr.msk.f32.vlgmr.msra.gmra.mxu0 %vm1385_vm14, %v1369_v35 }
 0x325   : > { %v1561_v43 = vsel %vm656_vm8, %v1556_v56, %v1558_v41  ;;  %v1562_v44 = vsel %vm656_vm8, %v1558_v41, %v1560_v30  ;;  %1726 = vmatprep.mubr.f32.mxu0 %v4998_v3  ;;  %v1655_v53 = vsel %vm762_vm9, %v1650_v13, %v1652_v38 }
 0x326   : > { %1598 = vmatprep.subr.mxu1 %v1562_v44 }
 0x327   : > { %1599 = vmatpush1.msra.mxu1 %v1561_v43 }
 0x328   : > { %v1921_v46 = vpop.permute.xlu1 %1920  ;;  %1770 = vmatprep.subr.mxu1 %v5359_v7  ;;  %v1654_v47 = vpop.permute.xlu0 %1653  ;;  %4467 = vmatmul.mubr.msk.f32.vlgmr.msra.gmra.mxu1 %vm1385_vm14, %v4466_v45  ;;  %v2247_v7 = vld [vmem:[%s6082_s3 + $0xf8] sm:$0xff] }
 0x329   : > { %1771 = vmatpush1.msra.mxu1 %v5357_v6  ;;  %v1656_v49 = vsel %vm762_vm9, %v1652_v38, %v1654_v47  ;;  %v1925_v50 = vsel %vm637_vm4, %v1921_v46, %v1923_v18  ;;  %1804 = vmatprep.mubr.f32.mxu1 %v4998_v3 }
 0x32a   : > { %1692 = vmatprep.subr.mxu0 %v1656_v49  ;;  %1961 = vmatprep.subr.mxu1 %v1925_v50  ;;  %v2246_v49 = vld [vmem:[%s6082_s3 + $0xf0] sm:$0xff] }
 0x32b   : > { %1693 = vmatpush1.msra.mxu0 %v1655_v53  ;;  %v2230_v50 = vld [vmem:[%s6082_s3 + $0x70] sm:$0xff]  ;;  %v2244_v53 = vld [vmem:[%s6082_s3 + $0xe0] sm:$0xff] }
 0x32c   : > { %v1919_v57 = vpop.permute.xlu1 %1918  ;;  %v1827_v58 = vpop.permute.xlu0 %1826  ;;  %4469 = vmatmul.mubr.msk.f32.vlgmr.msra.gmra.mxu0 %vm1385_vm14, %v4468_v51  ;;  %4471 = vmatmul.mubr.msk.f32.vlgmr.msra.gmra.mxu1 %vm1385_vm14, %v4470_v52  ;;  %v2245_v51 = vld [vmem:[%s6082_s3 + $0xe8] sm:$0xff] }
 0x32d   : > { %v1924_v17 = vsel %vm637_vm4, %v1919_v57, %v1921_v46  ;;  %v1831_v24 = vsel %vm743_vm6, %v1827_v58, %v1829_v14  ;;  %1901 = vmatprep.mubr.f32.mxu0 %v4998_v3  ;;  %1995 = vmatprep.mubr.f32.mxu1 %v4998_v3  ;;  %v2229_v52 = vld [vmem:[%s6082_s3 + $0x68] sm:$0xff]  ;;  %v2228_v57 = vld [vmem:[%s6082_s3 + $0x60] sm:$0xff]  ;;  %vm2543_vm4 = vcmask 56320  }
 0x32e   : > { %1867 = vmatprep.subr.mxu0 %v1831_v24  ;;  %1962 = vmatpush1.msra.mxu1 %v1924_v17  ;;  %v2227_v17 = vld [vmem:[%s6082_s3 + $0x58] sm:$0xff]  ;;  %v2242_v24 = vld [vmem:[%s6082_s3 + $0xd0] sm:$0xff] }
 0x330   : > { %v1825_v61 = vpop.permute.xlu0 %1824  ;;  %4475 = vmatmul.mubr.msk.f32.vlgmr.msra.gmra.mxu1 %vm1385_vm14, %v4474_v60  ;;  %v2106_v63 = vpop.permute.xlu1 %2105  ;;  %v2226_v60 = vld [vmem:[%s6082_s3 + $0x50] sm:$0xff] }
 0x331   : > { %v1830_v0 = vsel %vm743_vm6, %v1825_v61, %v1827_v58  ;;  %2180 = vmatprep.mubr.f32.mxu1 %v4998_v3  ;;  %v2243_v58 = vld [vmem:[%s6082_s3 + $0xd8] sm:$0xff]  ;;  %v2241_v61 = vld [vmem:[%s6082_s3 + $0xc8] sm:$0xff] }
 0x332   : > { %1868 = vmatpush1.msra.mxu0 %v1830_v0  ;;  %v2224_v0 = vld [vmem:[%s6082_s3 + $0x40] sm:$0xff] }
 0x333   : > { %4473 = vmatmul.mubr.msk.f32.vlgmr.msra.gmra.mxu0 %vm1385_vm14, %v4472_v62  ;;  %2052 = vmatprep.subr.mxu0 %v2016_v16  ;;  %v2225_v62 = vld [vmem:[%s6082_s3 + $0x48] sm:$0xff]  ;;  %v2239_v16 = vld [vmem:[%s6082_s3 + $0xb8] sm:$0xff] }
 0x334   : > { %v2010_v28 = vpop.permute.xlu0 %2009  ;;  %2086 = vmatprep.mubr.f32.mxu0 %v4998_v3  ;;  %v2104_v2 = vpop.permute.xlu1 %2103 }
 0x335   : > { %v2015_v1 = vsel %vm1149_vm10, %v2010_v28, %v2012_v27  ;;  %v2109_v6 = vsel %vm432_vm3, %v2104_v2, %v2106_v63  ;;  %v2223_v28 = vld [vmem:[%s6082_s3 + $0x38] sm:$0xff]  ;;  %v2237_v2 = vld [vmem:[%s6082_s3 + $0xa8] sm:$0xff] }
 0x336   : > { %2053 = vmatpush1.msra.mxu0 %v2015_v1  ;;  %v2222_v1 = vld [vmem:[%s6082_s3 + $0x30] sm:$0xff] }
 0x337   : > { %4477 = vmatmul.mubr.msk.f32.vlgmr.msra.gmra.mxu0 %vm1385_vm14, %v4476_v59  ;;  %4567 = vmatprep.subr.mxu0 %v2247_v7  ;;  %v2238_v59 = vld [vmem:[%s6082_s3 + $0xb0] sm:$0xff]  ;;  %v2219_v7 = vld [vmem:[%s6082_s3 + $0x18] sm:$0xff] }
 0x338   : > { %v2108_v4 = vpop.permute.xlu0 %2107  ;;  %4568 = vmatpush3.msra.mxu0 %v2231_v8  ;;  %v2234_v8 = vld [vmem:[%s6082_s3 + $0x90] sm:$0xff] }
 0x339   : > { %v2110_v34 = vsel %vm432_vm3, %v2106_v63, %v2108_v4  ;;  %4569 = vmatprep.subr.mxu0 %v2246_v49  ;;  %v2240_v63 = vld [vmem:[%s6082_s3 + $0xc0] sm:$0xff]  ;;  %v2221_v4 = vld [vmem:[%s6082_s3 + $0x28] sm:$0xff]  ;;  %vm2440_vm3 = vcmask 72704  }
 0x33a   : > { %2146 = vmatprep.subr.mxu1 %v2110_v34  ;;  %4570 = vmatpush3.msra.mxu0 %v2230_v50  ;;  %v2236_v34 = vld [vmem:[%s6082_s3 + $0xa0] sm:$0xff] }
 0x33b   : > { %2147 = vmatpush1.msra.mxu1 %v2109_v6  ;;  %4571 = vmatprep.subr.mxu0 %v2245_v51  ;;  %v2235_v6 = vld [vmem:[%s6082_s3 + $0x98] sm:$0xff] }
 0x33c   : > { %4479 = vmatmul.mubr.msk.f32.vlgmr.msra.gmra.mxu1 %vm1385_vm14, %v4478_v5  ;;  %4572 = vmatpush3.msra.mxu0 %v2229_v52  ;;  %v2220_v5 = vld [vmem:[%s6082_s3 + $0x20] sm:$0xff] }
 0x33d   : > { %4573 = vmatprep.subr.mxu0 %v2244_v53 }
 0x33e   : > { %4574 = vmatpush3.msra.mxu0 %v2228_v57 }
 0x33f   : > { %4575 = vmatprep.subr.mxu0 %v2243_v58  ;;  %v4512_v58 = vld [vmem:[%s6085_s5 + $0x80] sm:$0xff] }
 0x340   : > { %4576 = vmatpush3.msra.mxu0 %v2227_v17 }
 0x341   : > { %4577 = vmatprep.subr.mxu0 %v2242_v24 }
 0x342   : > { %4578 = vmatpush3.msra.mxu0 %v2226_v60 }
 0x343   : > { %4579 = vmatprep.subr.mxu0 %v2241_v61 }
 0x344   : > { %4580 = vmatpush3.msra.mxu0 %v2225_v62  ;;  %v4482_v62 = vld [vmem:[%s6085_s5 + $0x18] sm:$0xff] }
 0x345   : > { %4581 = vmatprep.subr.mxu0 %v2240_v63  ;;  %v2340_v63 = vld [vmem:[%s6085_s5] sm:$0xff] }
 0x346   : > { %4582 = vmatpush3.msra.mxu0 %v2224_v0 }
 0x347   : > { %4583 = vmatprep.subr.mxu0 %v2239_v16 }
 0x348   : > { %4584 = vmatpush3.msra.mxu0 %v2223_v28 }
 0x349   : > { %4585 = vmatprep.subr.mxu0 %v2238_v59  ;;  %v2341_v59 = vld [vmem:[%s6085_s5 + $0x8] sm:$0xff] }
 0x34a   : > { %4586 = vmatpush3.msra.mxu0 %v2222_v1  ;;  %v4488_v1 = vld [vmem:[%s6085_s5 + $0x20] sm:$0xff] }
 0x34b   : > { %4587 = vmatprep.subr.mxu0 %v2237_v2 }
 0x34c   : > { %4588 = vmatpush3.msra.mxu0 %v2221_v4 }
 0x34d   : > { %4589 = vmatprep.subr.mxu0 %v2236_v34  ;;  %v4489_v34 = vld [vmem:[%s6085_s5 + $0x28] sm:$0xff] }
 0x34e   : > { %4590 = vmatpush3.msra.mxu0 %v2220_v5  ;;  %v4492_v5 = vld [vmem:[%s6085_s5 + $0x30] sm:$0xff] }
 0x34f   : > { %4591 = vmatprep.subr.mxu0 %v2235_v6 }
 0x350   : > { %4592 = vmatpush3.msra.mxu0 %v2219_v7 }
 0x351   : > { %4593 = vmatprep.subr.mxu0 %v2234_v8 }
 0x3dc   : > { %v1455_v9 = vpop.f32.mrf.mxu1 }
 0x3de   : > { %v1457_v10 = vpop.f32.mrf.mxu1 }
 0x3e4   : > { %v1542_v11 = vpop.f32.mrf.mxu0 }
 0x3e5   : > { %v1543_v37 = vadd.f32 %v1542_v11, %v1455_v9  ;;  %v2218_v9 = vld [vmem:[%s6082_s3 + $0x10] sm:$0xff]  ;;  %v2217_v11 = vld [vmem:[%s6082_s3 + $0x8] sm:$0xff] }
 0x3e6   : > { %v1544_v20 = vpop.f32.mrf.mxu0  ;;  %4594 = vmatpush3.msra.mxu0 %v2218_v9  ;;  %v4493_v9 = vld [vmem:[%s6085_s5 + $0x38] sm:$0xff] }
 0x3e7   : > { %v1545_v19 = vadd.f32 %v1544_v20, %v1457_v10  ;;  %v2233_v10 = vld [vmem:[%s6082_s3 + $0x88] sm:$0xff]  ;;  %v2216_v20 = vld [vmem:[%s6082_s3] sm:$0xff] }
 0x3e8   : > { %v1634_v42 = vpop.f32.mrf.mxu1  ;;  %4595 = vmatprep.subr.mxu0 %v2233_v10  ;;  %v4496_v10 = vld [vmem:[%s6085_s5 + $0x40] sm:$0xff] }
 0x3e9   : > { %v1639_v48 = vadd.f32 %v1634_v42, %v1543_v37  ;;  %v2232_v37 = vld [vmem:[%s6082_s3 + $0x80] sm:$0xff]  ;;  %4596 = vmatpush3.msra.mxu0 %v2217_v11 }
 0x3ea   : > { %v1636_v23 = vpop.f32.mrf.mxu1  ;;  %v4487_v42 = vld [vmem:[%s6041_s8 + $0x1] ss:$0 sm:$0xff]  ;;  %4597 = vmatprep.subr.mxu0 %v2232_v37 }
 0x3eb   : > { %v1640_v54 = vadd.f32 %v1636_v23, %v1545_v19  ;;  %v4480_v19 = vld [vmem:[%s6041_s8] ss:$0 sm:$0xff]  ;;  %4598 = vmatpush3.msra.mxu0 %v2216_v20  ;;  %v4497_v20 = vld [vmem:[%s6085_s5 + $0x48] sm:$0xff] }
 0x3ec   : > { %v1728_v55 = vpop.f32.mrf.mxu0  ;;  %v1806_v33 = vpop.f32.mrf.mxu1 }
 0x3ed   : > { %v1733_v29 = vadd.f32 %v1728_v55, %v1639_v48  ;;  %v5591_v48 = vld [vmem:[#allocation2] sm:$0xff] }
 0x3ee   : > { %v1730_v12 = vpop.f32.mrf.mxu0  ;;  %v1808_v13 = vpop.f32.mrf.mxu1 }
 0x3ef   : > { %v1734_v56 = vadd.f32 %v1730_v12, %v1640_v54  ;;  %v1811_v14 = vadd.f32 %v1806_v33, %v1733_v29 }
 0x3f0   : > { %v1997_v18 = vpop.f32.mrf.mxu1 }
 0x3f1   : > { %v1812_v15 = vadd.f32 %v1808_v13, %v1734_v56 }
 0x3f2   : > { %v1999_v39 = vpop.f32.mrf.mxu1 }
 0x3f3   : > { %v1903_v21 = vpop.f32.mrf.mxu0 }
 0x3f4   : > { %v1908_v22 = vadd.f32 %v1903_v21, %v1811_v14 }
 0x3f5   : > { %v1905_v40 = vpop.f32.mrf.mxu0 }
 0x3f6   : > { %v1909_v25 = vadd.f32 %v1905_v40, %v1812_v15  ;;  %v2002_v26 = vadd.f32 %v1997_v18, %v1908_v22 }
 0x3f7   : > { %v2088_v27 = vpop.f32.mrf.mxu0 }
 0x3f8   : > { %v2003_v30 = vadd.f32 %v1999_v39, %v1909_v25  ;;  %v2093_v32 = vadd.f32 %v2088_v27, %v2002_v26 }
 0x3f9   : > { %v2090_v31 = vpop.f32.mrf.mxu0 }
 0x3fa   : > { %v2094_v36 = vadd.f32 %v2090_v31, %v2003_v30 }
 0x3fc   : > { %v2182_v35 = vpop.f32.mrf.mxu1 }
 0x3fd   : > { %v5479_v38 = vadd.f32 %v2182_v35, %v2093_v32 }
 0x3fe   : > { %v2184_v41 = vpop.f32.mrf.mxu1 }
 0x3ff   : > { %v5481_v43 = vadd.f32 %v2184_v41, %v2094_v36  ;;  %v2192_v45 = vmul.f32 %v5479_v38, %v5479_v38  ;;  %v4481_v41 = vld [vmem:[%s6085_s5 + $0x10] sm:$0xff] }
 0x400   : > { %4677 = vmatprep.mubr.msk.f32.mxu1 %vm1385_vm14, %v4481_v41 }
 0x401   : > { %v2189_v44 = vadd.f32 %v5481_v43, %v5479_v38  ;;  %v2193_v46 = vmul.f32 %v5481_v43, %v5481_v43 }
 0x403   : > { %2190 = vadd.xlane.f32.xlu0 %v2189_v44  ;;  %v2194_v47 = vadd.f32 %v2193_v46, %v2192_v45 }
 0x405   : > { %2195 = vadd.xlane.f32.xlu1 %v2194_v47 }
 0x416   : > { %2529 = vrot.lane.b32.xlu1 %v4487_v42, %s6065_s29 }
 0x419   : > { %2335 = vrot.lane.b32.xlu0 %v4480_v19, %s6055_s25  ;;  %s6057_s25 = smov 120  }
 0x41a   : > { %2814 = vrot.lane.b32.xlu1 %v4487_v42, %s6084_s30 }
 0x41d   : > { %2629 = vrot.lane.b32.xlu0 %v4480_v19, %s6083_s22 }
 0x41e   : > { %3091 = vrot.lane.b32.xlu1 %v4487_v42, %s6061_s13  ;;  %v4500_v42 = vld [vmem:[%s6085_s5 + $0x50] sm:$0xff] }
 0x421   : > { %2908 = vrot.lane.b32.xlu0 %v4480_v19, %s6059_s12 }
 0x425   : > { %2347 = vrot.lane.b32.xlu0 %v5591_v48, %s6063_s24 }
 0x48c   : > { %v2191_v23 = vpop.xlane.xlu0 %2190 }
 0x48d   : > { %v2197_v54 = vmul.f32 0.00390625, %v2191_v23  ;;  %v4513_v23 = vld [vmem:[%s6085_s5 + $0x88] sm:$0xff] }
 0x48e   : > { %v2196_v55 = vpop.xlane.xlu1 %2195 }
 0x48f   : > { %v2198_v33 = vmul.f32 0.00390625, %v2196_v55  ;;  %v2199_v29 = vmul.f32 %v2197_v54, %v2197_v54  ;;  %v2202_v14 = vsub.f32 %v5479_v38, %v2197_v54  ;;  %v2203_v15 = vsub.f32 %v5481_v43, %v2197_v54  ;;  %v4501_v54 = vld [vmem:[%s6085_s5 + $0x58] sm:$0xff]  ;;  %v4504_v55 = vld [vmem:[%s6085_s5 + $0x60] sm:$0xff] }
 0x490   : > { %v5607_v27 = vpop.permute.xlu0 %2335 }
 0x491   : > { %v2200_v12 = vsub.f32 %v2198_v33, %v2199_v29  ;;  %v5613_v30 = vmul.f32 %v5607_v27, %v5591_v48  ;;  %v4505_v29 = vld [vmem:[%s6085_s5 + $0x68] sm:$0xff] }
 0x492   : > { %v5615_v31 = vpop.permute.xlu1 %2529 }
 0x493   : > { %v2201_v13 = vmax.f32 %v2200_v12, 0.0  ;;  %2436 = vrot.lane.b32.xlu0 %v5613_v30, %s6061_s13  ;;  %v5621_v32 = vmul.f32 %v5615_v31, %v5591_v48  ;;  %v4508_v12 = vld [vmem:[%s6085_s5 + $0x70] sm:$0xff] }
 0x494   : > { %v5625_v35 = vpop.permute.xlu0 %2629 }
 0x495   : > { %v2204_v56 = vadd.f32 1e-05, %v2201_v13  ;;  %v5629_v3 = vmul.f32 %v5625_v35, %v5591_v48  ;;  %v4509_v13 = vld [vmem:[%s6085_s5 + $0x78] sm:$0xff] }
 0x496   : > { %v5638_v44 = vpop.permute.xlu1 %2814 }
 0x497   : > { %4870 = vrsqrt.f32 %v2204_v56  ;;  %2539 = vrot.lane.b32.xlu0 %v5621_v32, %s6059_s12 }
 0x498   : > { %v5649_v51 = vpop.permute.xlu0 %2908 }
 0x49a   : > { %v5653_v53 = vpop.permute.xlu1 %3091 }
 0x49b   : > { %2639 = vrot.lane.b32.xlu0 %v5629_v3, %s6084_s30 }
 0x49c   : > { %v2348_v17 = vpop.permute.xlu0 %2347 }
 0x4a4   : > { %v4871_v18 = vpop.eup %4870 }
 0x4a5   : > { %v2207_v21 = vmul.f32 %v4871_v18, %v2203_v15  ;;  %v2206_v22 = vmul.f32 %v4871_v18, %v2202_v14 }
 0x4a7   : > { %vm2209_vm15 = vcmp.ge.f32.partialorder %v2207_v21, 0.0  ;;  %v2211_v40 = vmul.f32 0.2, %v2207_v21  ;;  %vm2208_vm0 = vcmp.ge.f32.partialorder %v2206_v22, 0.0  ;;  %v2210_v25 = vmul.f32 0.2, %v2206_v22 }
 0x4a9   : > { %v2213_v39 = vsel %vm2209_vm15, %v2207_v21, %v2211_v40  ;;  %v2212_v26 = vsel %vm2208_vm0, %v2206_v22, %v2210_v25 }
 0x4aa   : > { %2215 = vst [vmem:[%s5603_s15 + $0x8] sm:$0xff] %v2213_v39  ;;  %2312 = vmatprep.mubr.f32.mxu0 %v2213_v39  ;;  %2214 = vst [vmem:[%s5603_s15] sm:$0xff] %v2212_v26 }
 0x4ab   : > { %2313 = vmatmul.mubr.f32.vlgmr.msra.gmra.mxu0 %v2212_v26 }
 0x4ac   : > { %4717 = vmatprep.mubr.msk.f32.mxu0 %vm1385_vm14, %v4512_v58 }
 0x505   : > { %v2437_v24 = vpop.permute.xlu0 %2436 }
 0x509   : > { %v2540_v16 = vpop.permute.xlu0 %2539 }
 0x50d   : > { %v2640_v6 = vpop.permute.xlu0 %2639 }
 0x56b   : > { %v4599_v36 = vpop.f32.mrf.mxu0 }
 0x56d   : > { %v4600_v38 = vpop.f32.mrf.mxu0 }
 0x56e   : > { %v4601_v43 = vadd.f32 %v4600_v38, %v4599_v36 }
 0x570   : > { %2327 = vst.msk [vmem:[#allocation2 + $0x8] sm:$0xff] %vm2326_vm2, %v4601_v43 }
 0x577   : > { %v2329_v45 = vld [vmem:[#allocation2 + $0x8] sm:$0xff] }
 0x578   : > { %v2817_v46 = vmul.f32 %v5638_v44, %v2329_v45  ;;  %2349 = vrot.lane.b32.xlu1 %v2329_v45, %s6063_s24  ;;  %v2339_v47 = vmul.f32 %v5607_v27, %v2329_v45  ;;  %v2533_v49 = vmul.f32 %v5615_v31, %v2329_v45  ;;  %v2633_v50 = vmul.f32 %v5625_v35, %v2329_v45  ;;  %s6092_s24 = smov 121  }
 0x579   : > { %v2911_v52 = vmul.f32 %v5649_v51, %v2329_v45  ;;  %v3094_v57 = vmul.f32 %v5653_v53, %v2329_v45 }
 0x57a   : > { %2822 = vrot.lane.b32.xlu0 %v2817_v46, %s6083_s22 }
 0x57c   : > { %2438 = vrot.lane.b32.xlu1 %v2339_v47, %s6061_s13  ;;  %s6089_s13 = smov 7  }
 0x57e   : > { %3005 = vrot.lane.b32.xlu0 %v2329_v45, %s6057_s25  ;;  %s6087_s25 = smov 8  }
 0x580   : > { %2541 = vrot.lane.b32.xlu1 %v2533_v49, %s6059_s12  ;;  %s6086_s12 = smov 119  }
 0x584   : > { %2641 = vrot.lane.b32.xlu1 %v2633_v50, %s6084_s30 }
 0x588   : > { %2916 = vrot.lane.b32.xlu1 %v2911_v52, %s6065_s29  ;;  %s390_s29 = scalar_lea.vmem [#allocation5], %s5600_s16 }
 0x58c   : > { %3099 = vrot.lane.b32.xlu1 %v3094_v57, %s6086_s12 }
 0x5ea   : > { %v2350_v60 = vpop.permute.xlu1 %2349 }
 0x5eb   : > { %v2351_v61 = vsel %vm1385_vm14, %v2348_v17, %v2350_v60 }
 0x5ec   : > { %4675 = vmatprep.subr.mxu1 %v2351_v61  ;;  %v2823_v37 = vpop.permute.xlu0 %2822 }
 0x5ed   : > { %4676 = vmatpush3.msra.mxu1 %v2351_v61 }
 0x5ee   : > { %v2439_v0 = vpop.permute.xlu1 %2438  ;;  %4678 = vmatmul.mubr.msk.f32.vlgmr.msra.gmra.mxu1 %vm1385_vm14, %v4482_v62 }
 0x5ef   : > { %v2441_v28 = vsel %vm2440_vm3, %v2437_v24, %v2439_v0  ;;  %4682 = vmatprep.mubr.msk.f32.mxu1 %vm1385_vm14, %v2340_v63 }
 0x5f0   : > { %4680 = vmatprep.subr.mxu1 %v2441_v28  ;;  %v3006_v33 = vpop.permute.xlu0 %3005 }
 0x5f1   : > { %4681 = vmatpush3.msra.mxu1 %v2441_v28 }
 0x5f2   : > { %v2542_v2 = vpop.permute.xlu1 %2541  ;;  %4683 = vmatmul.mubr.msk.f32.vlgmr.msra.gmra.mxu1 %vm1385_vm14, %v2341_v59 }
 0x5f3   : > { %v2544_v4 = vsel %vm2543_vm4, %v2540_v16, %v2542_v2  ;;  %4687 = vmatprep.mubr.msk.f32.mxu1 %vm1385_vm14, %v4488_v1 }
 0x5f4   : > { %4685 = vmatprep.subr.mxu1 %v2544_v4 }
 0x5f5   : > { %4686 = vmatpush3.msra.mxu1 %v2544_v4 }
 0x5f6   : > { %v2642_v7 = vpop.permute.xlu1 %2641  ;;  %4688 = vmatmul.mubr.msk.f32.vlgmr.msra.gmra.mxu1 %vm1385_vm14, %v4489_v34 }
 0x5f7   : > { %v2643_v8 = vsel %vm762_vm9, %v2640_v6, %v2642_v7  ;;  %4692 = vmatprep.mubr.msk.f32.mxu1 %vm1385_vm14, %v4492_v5 }
 0x5f8   : > { %4690 = vmatprep.subr.mxu1 %v2643_v8 }
 0x5f9   : > { %4691 = vmatpush3.msra.mxu1 %v2643_v8 }
 0x5fa   : > { %v2917_v11 = vpop.permute.xlu1 %2916  ;;  %4693 = vmatmul.mubr.msk.f32.vlgmr.msra.gmra.mxu1 %vm1385_vm14, %v4493_v9  ;;  %4695 = vmatprep.subr.mxu1 %v2329_v45  ;;  %v3227_v9 = vld [vmem:[#allocation2 + $0x20] sm:$0xff] }
 0x5fb   : > { %4696 = vmatpush3.msra.mxu1 %v2329_v45  ;;  %4697 = vmatprep.mubr.msk.f32.mxu1 %vm1385_vm14, %v4496_v10  ;;  %v3231_v10 = vmul.f32 %v3227_v9, %v5607_v27 }
 0x5fc   : > { %4700 = vmatprep.subr.mxu1 %v2823_v37 }
 0x5fe   : > { %v3100_v19 = vpop.permute.xlu1 %3099  ;;  %4698 = vmatmul.mubr.msk.f32.vlgmr.msra.gmra.mxu1 %vm1385_vm14, %v4497_v20 }
 0x5ff   : > { %4701 = vmatpush3.msra.mxu1 %v2823_v37  ;;  %4715 = vmatprep.subr.mxu0 %v3100_v19  ;;  %v3540_v37 = vmul.f32 %v3227_v9, %v5625_v35 }
 0x600   : > { %4705 = vmatprep.subr.mxu1 %v2917_v11  ;;  %4716 = vmatpush3.msra.mxu0 %v3100_v19 }
 0x601   : > { %4702 = vmatprep.mubr.msk.f32.mxu1 %vm1385_vm14, %v4500_v42  ;;  %4718 = vmatmul.mubr.msk.f32.vlgmr.msra.gmra.mxu0 %vm1385_vm14, %v4513_v23 }
 0x602   : > { %4703 = vmatmul.mubr.msk.f32.vlgmr.msra.gmra.mxu1 %vm1385_vm14, %v4501_v54 }
 0x603   : > { %4706 = vmatpush3.msra.mxu1 %v2917_v11  ;;  %4707 = vmatprep.mubr.msk.f32.mxu1 %vm1385_vm14, %v4504_v55  ;;  %v3434_v11 = vmul.f32 %v3227_v9, %v5615_v31 }
 0x604   : > { %4710 = vmatprep.subr.mxu1 %v3006_v33 }
 0x606   : > { %4708 = vmatmul.mubr.msk.f32.vlgmr.msra.gmra.mxu1 %vm1385_vm14, %v4505_v29 }
 0x607   : > { %4711 = vmatpush3.msra.mxu1 %v3006_v33  ;;  %4712 = vmatprep.mubr.msk.f32.mxu1 %vm1385_vm14, %v4508_v12 }
 0x60a   : > { %4713 = vmatmul.mubr.msk.f32.vlgmr.msra.gmra.mxu1 %vm1385_vm14, %v4509_v13 }
 0x6ae   : > { %v4679_v56 = vpop.f32.mrf.mxu1 }
 0x6b0   : > { %v2425_v14 = vpop.f32.mrf.mxu1 }
 0x6b2   : > { %v4684_v15 = vpop.f32.mrf.mxu1 }
 0x6b3   : > { %v2521_v26 = vadd.f32 %v4684_v15, %v4679_v56 }
 0x6b4   : > { %v2515_v18 = vpop.f32.mrf.mxu1 }
 0x6b5   : > { %v2516_v38 = vadd.f32 %v2515_v18, %v2425_v14 }
 0x6b6   : > { %v4689_v21 = vpop.f32.mrf.mxu1 }
 0x6b7   : > { %v2628_v41 = vadd.f32 %v4689_v21, %v2521_v26 }
 0x6b8   : > { %v2618_v22 = vpop.f32.mrf.mxu1 }
 0x6b9   : > { %v2627_v45 = vadd.f32 %v2618_v22, %v2516_v38 }
 0x6ba   : > { %v4694_v40 = vpop.f32.mrf.mxu1 }
 0x6bb   : > { %v2727_v46 = vadd.f32 %v4694_v40, %v2628_v41 }
 0x6bc   : > { %v2717_v25 = vpop.f32.mrf.mxu1 }
 0x6bd   : > { %v2726_v49 = vadd.f32 %v2717_v25, %v2627_v45 }
 0x6be   : > { %v4699_v39 = vpop.f32.mrf.mxu1 }
 0x6bf   : > { %v2813_v50 = vadd.f32 %v4699_v39, %v2727_v46 }
 0x6c0   : > { %v2803_v36 = vpop.f32.mrf.mxu1 }
 0x6c1   : > { %v2812_v57 = vadd.f32 %v2803_v36, %v2726_v49  ;;  %v4719_v62 = vpop.f32.mrf.mxu0 }
 0x6c2   : > { %v4704_v43 = vpop.f32.mrf.mxu1 }
 0x6c3   : > { %v2907_v58 = vadd.f32 %v4704_v43, %v2813_v50  ;;  %v3174_v1 = vpop.f32.mrf.mxu0  ;;  %v4516_v43 = vld [vmem:[%s6090_s6 + $0x10] sm:$0xff] }
 0x6c4   : > { %v2897_v47 = vpop.f32.mrf.mxu1  ;;  %4724 = vmatprep.mubr.msk.f32.mxu1 %vm452_vm5, %v4516_v43 }
 0x6c5   : > { %v2906_v24 = vadd.f32 %v2897_v47, %v2812_v57 }
 0x6c6   : > { %v4709_v52 = vpop.f32.mrf.mxu1 }
 0x6c7   : > { %v3001_v60 = vadd.f32 %v4709_v52, %v2907_v58 }
 0x6c8   : > { %v2991_v17 = vpop.f32.mrf.mxu1 }
 0x6c9   : > { %v3000_v63 = vadd.f32 %v2991_v17, %v2906_v24 }
 0x6ca   : > { %v4714_v61 = vpop.f32.mrf.mxu1 }
 0x6cb   : > { %v3090_v0 = vadd.f32 %v4714_v61, %v3001_v60 }
 0x6cc   : > { %v3080_v16 = vpop.f32.mrf.mxu1 }
 0x6cd   : > { %v3089_v28 = vadd.f32 %v3080_v16, %v3000_v63  ;;  %v3184_v59 = vadd.f32 %v4719_v62, %v3090_v0 }
 0x6cf   : > { %v3183_v2 = vadd.f32 %v3174_v1, %v3089_v28  ;;  %v3188_v4 = vsel %vm2326_vm2, %v3184_v59, 0.0  ;;  %v3192_v34 = vmul.f32 %v3184_v59, %v3184_v59 }
 0x6d0   : > { %3189 = vadd.xlane.f32.xlu0 %v3188_v4  ;;  %v4522_v4 = vld [vmem:[%s6090_s6 + $0x20] sm:$0xff] }
 0x6d1   : > { %v3185_v5 = vsel %vm2326_vm2, %v3183_v2, 0.0  ;;  %v3196_v6 = vsel %vm2326_vm2, %v3192_v34, 0.0  ;;  %v3191_v7 = vmul.f32 %v3183_v2, %v3183_v2 }
 0x6d2   : > { %3186 = vadd.xlane.f32.xlu1 %v3185_v5 }
 0x6d3   : > { %v3193_v8 = vsel %vm2326_vm2, %v3191_v7, 0.0 }
 0x6d4   : > { %3197 = vadd.xlane.f32.xlu0 %v3196_v6 }
 0x6d8   : > { %3194 = vadd.xlane.f32.xlu0 %v3193_v8 }
 0x6e3   : > { %3246 = vrot.lane.b32.xlu1 %v3227_v9, %s6087_s25 }
 0x6e7   : > { %3242 = vrot.lane.b32.xlu1 %v5591_v48, %s6087_s25 }
 0x6ee   : > { %3343 = vrot.lane.b32.xlu0 %v3231_v10, %s6088_s14 }
 0x6f2   : > { %3339 = vrot.lane.b32.xlu0 %v5613_v30, %s6088_s14 }
 0x6f6   : > { %3447 = vrot.lane.b32.xlu0 %v3434_v11, %s6089_s13 }
 0x6fa   : > { %3443 = vrot.lane.b32.xlu0 %v5621_v32, %s6089_s13 }
 0x6fe   : > { %3553 = vrot.lane.b32.xlu0 %v3540_v37, %s6084_s30 }
 0x759   : > { %v3190_v20 = vpop.xlane.xlu0 %3189 }
 0x75a   : > { %v3200_v48 = vmul.f32 0.015625, %v3190_v20 }
 0x75b   : > { %v3187_v19 = vpop.xlane.xlu1 %3186 }
 0x75c   : > { %v3204_v23 = vmul.f32 %v3200_v48, %v3200_v48  ;;  %v3199_v54 = vmul.f32 0.015625, %v3187_v19  ;;  %v3210_v18 = vsub.f32 %v3184_v59, %v3200_v48  ;;  %v3234_v48 = vld [vmem:[%s6090_s6 + $0x8] sm:$0xff]  ;;  %v4526_v19 = vld [vmem:[%s6090_s6 + $0x30] sm:$0xff] }
 0x75d   : > { %v3198_v42 = vpop.xlane.xlu0 %3197 }
 0x75e   : > { %v3202_v55 = vmul.f32 0.015625, %v3198_v42  ;;  %v3203_v29 = vmul.f32 %v3199_v54, %v3199_v54  ;;  %v3209_v40 = vsub.f32 %v3183_v2, %v3199_v54 }
 0x75f   : > { %v3247_v16 = vpop.permute.xlu1 %3246 }
 0x760   : > { %v3206_v33 = vsub.f32 %v3202_v55, %v3204_v23  ;;  %v4523_v55 = vld [vmem:[%s6090_s6 + $0x28] sm:$0xff] }
 0x761   : > { %v3195_v30 = vpop.xlane.xlu0 %3194 }
 0x762   : > { %v3208_v12 = vmax.f32 %v3206_v33, 0.0  ;;  %v3201_v13 = vmul.f32 0.015625, %v3195_v30  ;;  %v4530_v30 = vld [vmem:[%s6090_s6 + $0x40] sm:$0xff] }
 0x763   : > { %v3243_v59 = vpop.permute.xlu1 %3242 }
 0x764   : > { %v3212_v56 = vadd.f32 1e-05, %v3208_v12  ;;  %v3205_v14 = vsub.f32 %v3201_v13, %v3203_v29  ;;  %v4527_v13 = vld [vmem:[%s6090_s6 + $0x38] sm:$0xff] }
 0x765   : > { %v3344_v62 = vpop.permute.xlu0 %3343 }
 0x766   : > { %4872 = vrsqrt.f32 %v3212_v56  ;;  %v3207_v32 = vmax.f32 %v3205_v14, 0.0  ;;  %v4531_v56 = vld [vmem:[%s6090_s6 + $0x48] sm:$0xff] }
 0x768   : > { %v3211_v15 = vadd.f32 1e-05, %v3207_v32 }
 0x769   : > { %v3340_v63 = vpop.permute.xlu0 %3339 }
 0x76a   : > { %4874 = vrsqrt.f32 %v3211_v15  ;;  %v4534_v15 = vld [vmem:[%s6090_s6 + $0x50] sm:$0xff] }
 0x773   : > { %v4873_v21 = vpop.eup %4872 }
 0x774   : > { %v3216_v22 = vmul.f32 %v4873_v21, %v3210_v18  ;;  %v4538_v18 = vld [vmem:[%s6090_s6 + $0x60] sm:$0xff]  ;;  %v4535_v21 = vld [vmem:[%s6090_s6 + $0x58] sm:$0xff] }
 0x776   : > { %vm3218_vm6 = vcmp.ge.f32.partialorder %v3216_v22, 0.0  ;;  %v3220_v25 = vmul.f32 0.2, %v3216_v22 }
 0x777   : > { %v4875_v39 = vpop.eup %4874 }
 0x778   : > { %v3222_v26 = vsel %vm3218_vm6, %v3216_v22, %v3220_v25  ;;  %v3215_v36 = vmul.f32 %v4875_v39, %v3209_v40  ;;  %v4539_v40 = vld [vmem:[%s6090_s6 + $0x68] sm:$0xff]  ;;  %v4542_v25 = vld [vmem:[%s6090_s6 + $0x70] sm:$0xff]  ;;  %v4543_v39 = vld [vmem:[%s6090_s6 + $0x78] sm:$0xff] }
 0x779   : > { %3224 = vst.msk [vmem:[#allocation2 + $0x28] sm:$0xff] %vm2326_vm2, %v3222_v26 }
 0x77a   : > { %vm3217_vm7 = vcmp.ge.f32.partialorder %v3215_v36, 0.0  ;;  %v3219_v38 = vmul.f32 0.2, %v3215_v36 }
 0x77c   : > { %v3221_v41 = vsel %vm3217_vm7, %v3215_v36, %v3219_v38  ;;  %v4546_v38 = vld [vmem:[%s6090_s6 + $0x80] sm:$0xff] }
 0x77d   : > { %3223 = vst.msk [vmem:[#allocation2 + $0x8] sm:$0xff] %vm2326_vm2, %v3221_v41  ;;  %v4547_v41 = vld [vmem:[%s6090_s6 + $0x88] sm:$0xff] }
 0x780   : > { %v5752_v45 = vld [vmem:[#allocation2 + $0x28] sm:$0xff] }
 0x781   : > { %3248 = vrot.lane.b32.xlu0 %v5752_v45, %s6087_s25  ;;  %v3232_v47 = vmul.f32 %v5752_v45, %v5607_v27  ;;  %v3731_v49 = vmul.f32 %v5752_v45, %v5638_v44  ;;  %v3435_v50 = vmul.f32 %v5752_v45, %v5615_v31  ;;  %v3827_v52 = vmul.f32 %v5752_v45, %v5649_v51 }
 0x782   : > { %v3541_v57 = vmul.f32 %v5752_v45, %v5625_v35  ;;  %v4015_v58 = vmul.f32 %v5752_v45, %v5653_v53 }
 0x784   : > { %v5757_v46 = vld [vmem:[#allocation2 + $0x8] sm:$0xff] }
 0x785   : > { %3549 = vrot.lane.b32.xlu0 %v5629_v3, %s6084_s30  ;;  %3244 = vrot.lane.b32.xlu1 %v5757_v46, %s6087_s25  ;;  %v3233_v3 = vld [vmem:[%s6090_s6] sm:$0xff]  ;;  %v3230_v17 = vmul.f32 %v5757_v46, %v5607_v27  ;;  %v3433_v24 = vmul.f32 %v5757_v46, %v5615_v31  ;;  %v3539_v60 = vmul.f32 %v5757_v46, %v5625_v35  ;;  %v3448_v35 = vpop.permute.xlu0 %3447 }
 0x786   : > { %4731 = vmatprep.mubr.msk.f32.mxu0 %vm452_vm5, %v3233_v3  ;;  %v3730_v61 = vmul.f32 %v5757_v46, %v5638_v44  ;;  %v3826_v27 = vmul.f32 %v5757_v46, %v5649_v51  ;;  %v4014_v31 = vmul.f32 %v5757_v46, %v5653_v53  ;;  %v4517_v53 = vld [vmem:[%s6090_s6 + $0x18] sm:$0xff] }
 0x789   : > { %3927 = vrot.lane.b32.xlu0 %v5752_v45, %s6091_s2  ;;  %3345 = vrot.lane.b32.xlu1 %v3232_v47, %s6088_s14  ;;  %v3444_v0 = vpop.permute.xlu0 %3443 }
 0x78d   : > { %3739 = vrot.lane.b32.xlu0 %v3731_v49, %s6083_s22  ;;  %3449 = vrot.lane.b32.xlu1 %v3435_v50, %s6089_s13  ;;  %v3554_v28 = vpop.permute.xlu0 %3553 }
 0x791   : > { %3835 = vrot.lane.b32.xlu0 %v3827_v52, %s6092_s24  ;;  %3555 = vrot.lane.b32.xlu1 %v3541_v57, %s6084_s30 }
 0x795   : > { %4023 = vrot.lane.b32.xlu0 %v4015_v58, %s6086_s12  ;;  %3925 = vrot.lane.b32.xlu1 %v5757_v46, %s6091_s2 }
 0x799   : > { %3341 = vrot.lane.b32.xlu1 %v3230_v17, %s6088_s14 }
 0x79d   : > { %3445 = vrot.lane.b32.xlu1 %v3433_v24, %s6089_s13 }
 0x7a1   : > { %3551 = vrot.lane.b32.xlu1 %v3539_v60, %s6084_s30  ;;  %s5926_s30 = sshll.u32 %s5098_s21, 8 }
 0x7a2   : > { %s5932_s13 = scalar_lea.hbm %s6043_s10, %s5926_s30 }
 0x7a5   : > { %3737 = vrot.lane.b32.xlu1 %v3730_v61, %s6083_s22  ;;  %s4246_s22 = sand.u32 1, %s5098_s21  }
 0x7a6   : > { %s5934_s1 = scalar_lea.sflag [#allocation6], %s4246_s22 }
 0x7a9   : > { %3833 = vrot.lane.b32.xlu1 %v3826_v27, %s6092_s24  ;;  %s4279_s24 = sshll.u32 %s390_s29, 4  ;;  %s5922_s24 = int_to_ptr.vmem [resolvable:$true] %s4279_s24 }
 0x7aa   : > { %s4880_s2 = scalar_lea.vmem %s5922_s24, 256 }
 0x7ab   : > { %p4881_p11 = scmp.ne.s32.totalorder %s5922_s24, %s4880_s2 }
 0x7ad   : > { %4021 = vrot.lane.b32.xlu1 %v4014_v31, %s6086_s12  ;;  %p4882_p12 = pnand %p4881_p11, %p5117_p5 }
 0x7af   : > { %p4883_p13 = pneg %p4882_p12 }
 0x7f3   : > { %v3249_v44 = vpop.permute.xlu0 %3248 }
 0x7f4   : > { %v3251_v1 = vsel %vm1385_vm14, %v3247_v16, %v3249_v44 }
 0x7f5   : > { %4720 = vmatprep.subr.mxu1 %v3251_v1 }
 0x7f6   : > { %4721 = vmatpush3.msra.mxu1 %v3251_v1 }
 0x7f7   : > { %v3245_v51 = vpop.permute.xlu1 %3244  ;;  %v3550_v9 = vpop.permute.xlu0 %3549 }
 0x7f8   : > { %v3250_v2 = vsel %vm1385_vm14, %v3243_v59, %v3245_v51 }
 0x7f9   : > { %4722 = vmatprep.subr.mxu1 %v3250_v2 }
 0x7fa   : > { %4723 = vmatpush3.msra.mxu1 %v3250_v2 }
 0x7fb   : > { %v3346_v34 = vpop.permute.xlu1 %3345  ;;  %4725 = vmatmul.mubr.msk.f32.vlgmr.msra.gmra.mxu1 %vm452_vm5, %v4517_v53  ;;  %v3928_v11 = vpop.permute.xlu0 %3927 }
 0x7fc   : > { %v3348_v5 = vsel %vm2440_vm3, %v3344_v62, %v3346_v34  ;;  %4738 = vmatprep.mubr.msk.f32.mxu1 %vm452_vm5, %v4522_v4 }
 0x7fd   : > { %4727 = vmatprep.subr.mxu0 %v3348_v5 }
 0x7fe   : > { %4728 = vmatpush3.msra.mxu0 %v3348_v5 }
 0x7ff   : > { %v3450_v6 = vpop.permute.xlu1 %3449  ;;  %v3740_v33 = vpop.permute.xlu0 %3739 }
 0x800   : > { %v3452_v7 = vsel %vm2543_vm4, %v3448_v35, %v3450_v6 }
 0x801   : > { %4734 = vmatprep.subr.mxu1 %v3452_v7 }
 0x802   : > { %4735 = vmatpush3.msra.mxu1 %v3452_v7 }
 0x803   : > { %v3556_v8 = vpop.permute.xlu1 %3555  ;;  %v3836_v14 = vpop.permute.xlu0 %3835 }
 0x804   : > { %v3558_v42 = vsel %vm762_vm9, %v3554_v28, %v3556_v8 }
 0x807   : > { %v3926_v10 = vpop.permute.xlu1 %3925  ;;  %v4024_v26 = vpop.permute.xlu0 %4023 }
 0x80b   : > { %v3342_v37 = vpop.permute.xlu1 %3341 }
 0x80c   : > { %v3347_v20 = vsel %vm2440_vm3, %v3340_v63, %v3342_v37 }
 0x80d   : > { %4729 = vmatprep.subr.mxu0 %v3347_v20 }
 0x80e   : > { %4730 = vmatpush3.msra.mxu0 %v3347_v20 }
 0x80f   : > { %4741 = vmatprep.subr.mxu0 %v3558_v42  ;;  %v3446_v23 = vpop.permute.xlu1 %3445  ;;  %4732 = vmatmul.mubr.msk.f32.vlgmr.msra.gmra.mxu0 %vm452_vm5, %v3234_v48 }
 0x810   : > { %4742 = vmatpush3.msra.mxu0 %v3558_v42  ;;  %v3451_v54 = vsel %vm2543_vm4, %v3444_v0, %v3446_v23  ;;  %4745 = vmatprep.mubr.msk.f32.mxu0 %vm452_vm5, %v4526_v19  ;;  %v4157_v19 = vld [vmem:[%s6040_s7 + $0x38] sm:$0xff]  ;;  %v4156_v42 = vld [vmem:[%s6040_s7 + $0x30] sm:$0xff]  ;;  %v4155_v23 = vld [vmem:[%s6040_s7 + $0x28] sm:$0xff] }
 0x811   : > { %4736 = vmatprep.subr.mxu1 %v3451_v54 }
 0x812   : > { %4737 = vmatpush3.msra.mxu1 %v3451_v54  ;;  %v4154_v54 = vld [vmem:[%s6040_s7 + $0x20] sm:$0xff] }
 0x813   : > { %4748 = vmatprep.subr.mxu1 %v5752_v45  ;;  %v3552_v29 = vpop.permute.xlu1 %3551  ;;  %4739 = vmatmul.mubr.msk.f32.vlgmr.msra.gmra.mxu1 %vm452_vm5, %v4523_v55  ;;  %v4153_v55 = vld [vmem:[%s6040_s7 + $0x18] sm:$0xff] }
 0x814   : > { %4749 = vmatpush3.msra.mxu1 %v5752_v45  ;;  %v3557_v12 = vsel %vm762_vm9, %v3550_v9, %v3552_v29  ;;  %4752 = vmatprep.mubr.msk.f32.mxu1 %vm452_vm5, %v4530_v30  ;;  %v4151_v30 = vld [vmem:[%s6040_s7 + $0x8] sm:$0xff]  ;;  %v4150_v29 = vld [vmem:[%s6040_s7] sm:$0xff] }
 0x815   : > { %4743 = vmatprep.subr.mxu0 %v3557_v12  ;;  %4750 = vmatprep.subr.mxu1 %v5757_v46 }
 0x816   : > { %4744 = vmatpush3.msra.mxu0 %v3557_v12  ;;  %4751 = vmatpush3.msra.mxu1 %v5757_v46 }
 0x817   : > { %4746 = vmatmul.mubr.msk.f32.vlgmr.msra.gmra.mxu0 %vm452_vm5, %v4527_v13  ;;  %4755 = vmatprep.subr.mxu0 %v3740_v33  ;;  %v3738_v32 = vpop.permute.xlu1 %3737 }
 0x818   : > { %4762 = vmatprep.subr.mxu1 %v3836_v14  ;;  %4753 = vmatmul.mubr.msk.f32.vlgmr.msra.gmra.mxu1 %vm452_vm5, %v4531_v56 }
 0x819   : > { %4756 = vmatpush3.msra.mxu0 %v3740_v33  ;;  %4763 = vmatpush3.msra.mxu1 %v3836_v14  ;;  %v4152_v33 = vld [vmem:[%s6040_s7 + $0x10] sm:$0xff] }
 0x81a   : > { %4757 = vmatprep.subr.mxu0 %v3738_v32  ;;  %4759 = vmatprep.mubr.msk.f32.mxu0 %vm452_vm5, %v4534_v15 }
 0x81b   : > { %4758 = vmatpush3.msra.mxu0 %v3738_v32  ;;  %v3834_v22 = vpop.permute.xlu1 %3833  ;;  %4766 = vmatprep.mubr.msk.f32.mxu1 %vm452_vm5, %v4538_v18 }
 0x81c   : > { %4760 = vmatmul.mubr.msk.f32.vlgmr.msra.gmra.mxu0 %vm452_vm5, %v4535_v21  ;;  %4769 = vmatprep.subr.mxu0 %v3928_v11 }
 0x81d   : > { %4764 = vmatprep.subr.mxu1 %v3834_v22  ;;  %4770 = vmatpush3.msra.mxu0 %v3928_v11 }
 0x81e   : > { %4765 = vmatpush3.msra.mxu1 %v3834_v22  ;;  %4771 = vmatprep.subr.mxu0 %v3926_v10 }
 0x81f   : > { %4767 = vmatmul.mubr.msk.f32.vlgmr.msra.gmra.mxu1 %vm452_vm5, %v4539_v40  ;;  %4772 = vmatpush3.msra.mxu0 %v3926_v10  ;;  %v4022_v36 = vpop.permute.xlu1 %4021 }
 0x820   : > { %4776 = vmatprep.subr.mxu1 %v4024_v26  ;;  %4773 = vmatprep.mubr.msk.f32.mxu0 %vm452_vm5, %v4542_v25 }
 0x821   : > { %4777 = vmatpush3.msra.mxu1 %v4024_v26  ;;  %4774 = vmatmul.mubr.msk.f32.vlgmr.msra.gmra.mxu0 %vm452_vm5, %v4543_v39 }
 0x822   : > { %4778 = vmatprep.subr.mxu1 %v4022_v36  ;;  %4780 = vmatprep.mubr.msk.f32.mxu1 %vm452_vm5, %v4546_v38 }
 0x823   : > { %4779 = vmatpush3.msra.mxu1 %v4022_v36  ;;  %4783 = vmatprep.subr.mxu0 %v4157_v19 }
 0x824   : > { %4781 = vmatmul.mubr.msk.f32.vlgmr.msra.gmra.mxu1 %vm452_vm5, %v4547_v41  ;;  %4784 = vmatpush3.msra.mxu0 %v4157_v19 }
 0x825   : > { %4785 = vmatprep.subr.mxu0 %v4156_v42 }
 0x826   : > { %4786 = vmatpush3.msra.mxu0 %v4156_v42 }
 0x827   : > { %4787 = vmatprep.subr.mxu0 %v4155_v23 }
 0x828   : > { %4788 = vmatpush3.msra.mxu0 %v4155_v23 }
 0x829   : > { %4789 = vmatprep.subr.mxu0 %v4154_v54 }
 0x82a   : > { %4790 = vmatpush3.msra.mxu0 %v4154_v54 }
 0x82b   : > { %4791 = vmatprep.subr.mxu0 %v4153_v55 }
 0x82c   : > { %4792 = vmatpush3.msra.mxu0 %v4153_v55 }
 0x82d   : > { %4793 = vmatprep.subr.mxu0 %v4152_v33 }
 0x82e   : > { %4794 = vmatpush3.msra.mxu0 %v4152_v33 }
 0x82f   : > { %4795 = vmatprep.subr.mxu0 %v4151_v30 }
 0x830   : > { %4796 = vmatpush3.msra.mxu0 %v4151_v30 }
 0x831   : > { %4797 = vmatprep.subr.mxu0 %v4150_v29 }
 0x832   : > { %4798 = vmatpush3.msra.mxu0 %v4150_v29 }
 0x8bb   : > { %v4726_v43 = vpop.f32.mrf.mxu1 }
 0x8bd   : > { %v3326_v45 = vpop.f32.mrf.mxu1 }
 0x8cf   : > { %v4733_v46 = vpop.f32.mrf.mxu0 }
 0x8d0   : > { %v3429_v47 = vadd.f32 %v4733_v46, %v4726_v43 }
 0x8d1   : > { %v3423_v49 = vpop.f32.mrf.mxu0 }
 0x8d2   : > { %v3424_v3 = vadd.f32 %v3423_v49, %v3326_v45 }
 0x8d3   : > { %v4740_v50 = vpop.f32.mrf.mxu1 }
 0x8d4   : > { %v3537_v52 = vadd.f32 %v4740_v50, %v3429_v47 }
 0x8d5   : > { %v3527_v57 = vpop.f32.mrf.mxu1 }
 0x8d6   : > { %v3536_v17 = vadd.f32 %v3527_v57, %v3424_v3 }
 0x8d7   : > { %v4747_v58 = vpop.f32.mrf.mxu0 }
 0x8d8   : > { %v3643_v24 = vadd.f32 %v4747_v58, %v3537_v52  ;;  %v4754_v60 = vpop.f32.mrf.mxu1 }
 0x8d9   : > { %v3633_v61 = vpop.f32.mrf.mxu0 }
 0x8da   : > { %v3642_v27 = vadd.f32 %v3633_v61, %v3536_v17  ;;  %v3729_v31 = vadd.f32 %v4754_v60, %v3643_v24  ;;  %v3719_v62 = vpop.f32.mrf.mxu1 }
 0x8dc   : > { %v3728_v63 = vadd.f32 %v3719_v62, %v3642_v27  ;;  %v4761_v35 = vpop.f32.mrf.mxu0 }
 0x8dd   : > { %v3825_v0 = vadd.f32 %v4761_v35, %v3729_v31 }
 0x8de   : > { %v3815_v16 = vpop.f32.mrf.mxu0 }
 0x8df   : > { %v3824_v28 = vadd.f32 %v3815_v16, %v3728_v63  ;;  %v4768_v59 = vpop.f32.mrf.mxu1 }
 0x8e0   : > { %v3921_v44 = vadd.f32 %v4768_v59, %v3825_v0 }
 0x8e1   : > { %v3911_v1 = vpop.f32.mrf.mxu1  ;;  %v4775_v51 = vpop.f32.mrf.mxu0 }
 0x8e2   : > { %v3920_v2 = vadd.f32 %v3911_v1, %v3824_v28  ;;  %v4013_v53 = vadd.f32 %v4775_v51, %v3921_v44 }
 0x8e3   : > { %v4003_v4 = vpop.f32.mrf.mxu0 }
 0x8e4   : > { %v4012_v34 = vadd.f32 %v4003_v4, %v3920_v2  ;;  %v4782_v5 = vpop.f32.mrf.mxu1 }
 0x8e5   : > { %v5883_v6 = vadd.f32 %v4782_v5, %v4013_v53 }
 0x8e6   : > { %v4099_v7 = vpop.f32.mrf.mxu1 }
 0x8e7   : > { %v4108_v8 = vadd.f32 %v4099_v7, %v4012_v34  ;;  %v4113_v9 = vsel %vm2326_vm2, %v5883_v6, 0.0  ;;  %v4117_v20 = vmul.f32 %v5883_v6, %v5883_v6 }
 0x8e8   : > { %4114 = vadd.xlane.f32.xlu1 %v4113_v9 }
 0x8e9   : > { %v4110_v10 = vsel %vm2326_vm2, %v4108_v8, 0.0  ;;  %v4116_v11 = vmul.f32 %v4108_v8, %v4108_v8  ;;  %v4121_v48 = vsel %vm2326_vm2, %v4117_v20, 0.0 }
 0x8ea   : > { %4111 = vadd.xlane.f32.xlu0 %v4110_v10 }
 0x8eb   : > { %v4118_v37 = vsel %vm2326_vm2, %v4116_v11, 0.0 }
 0x8ee   : > { %4119 = vadd.xlane.f32.xlu0 %v4118_v37 }
 0x8f2   : > { %4122 = vadd.xlane.f32.xlu0 %v4121_v48 }
 0x971   : > { %v4115_v56 = vpop.xlane.xlu1 %4114 }
 0x972   : > { %v4125_v32 = vmul.f32 0.015625, %v4115_v56 }
 0x973   : > { %v4112_v12 = vpop.xlane.xlu0 %4111 }
 0x974   : > { %v4124_v13 = vmul.f32 0.015625, %v4112_v12  ;;  %v4129_v40 = vmul.f32 %v4125_v32, %v4125_v32  ;;  %v4135_v47 = vsub.f32 %v5883_v6, %v4125_v32 }
 0x976   : > { %v4128_v15 = vmul.f32 %v4124_v13, %v4124_v13  ;;  %v4134_v43 = vsub.f32 %v4108_v8, %v4124_v13 }
 0x977   : > { %v4120_v14 = vpop.xlane.xlu0 %4119 }
 0x978   : > { %v4126_v18 = vmul.f32 0.015625, %v4120_v14 }
 0x97a   : > { %v4130_v21 = vsub.f32 %v4126_v18, %v4128_v15 }
 0x97b   : > { %v4123_v22 = vpop.xlane.xlu0 %4122 }
 0x97c   : > { %v4132_v25 = vmax.f32 %v4130_v21, 0.0  ;;  %v4127_v39 = vmul.f32 0.015625, %v4123_v22 }
 0x97e   : > { %v4136_v26 = vadd.f32 1e-05, %v4132_v25  ;;  %v4131_v36 = vsub.f32 %v4127_v39, %v4129_v40 }
 0x980   : > { %4876 = vrsqrt.f32 %v4136_v26  ;;  %v4133_v38 = vmax.f32 %v4131_v36, 0.0 }
 0x982   : > { %v4137_v41 = vadd.f32 1e-05, %v4133_v38 }
 0x984   : > { %4878 = vrsqrt.f32 %v4137_v41 }
 0x98d   : > { %v4877_v45 = vpop.eup %4876 }
 0x98e   : > { %v4140_v46 = vmul.f32 %v4877_v45, %v4134_v43 }
 0x990   : > { %vm4142_vm8 = vcmp.ge.f32.partialorder %v4140_v46, 0.0  ;;  %v4144_v49 = vmul.f32 0.2, %v4140_v46 }
 0x991   : > { %v4879_v50 = vpop.eup %4878 }
 0x992   : > { %v4146_v3 = vsel %vm4142_vm8, %v4140_v46, %v4144_v49  ;;  %v4141_v52 = vmul.f32 %v4879_v50, %v4135_v47 }
 0x993   : > { %4148 = vst.msk [vmem:[%s390_s29] sm:$0xff] %vm2326_vm2, %v4146_v3  ;;  %4799 = vmatprep.mubr.msk.f32.mxu0 %vm2326_vm2, %v4146_v3 }
 0x994   : > { %vm4143_vm9 = vcmp.ge.f32.partialorder %v4141_v52, 0.0  ;;  %v4145_v57 = vmul.f32 0.2, %v4141_v52 }
 0x996   : > { %v4147_v58 = vsel %vm4143_vm9, %v4141_v52, %v4145_v57 }
 0x997   : > { %4149 = vst.msk [vmem:[%s390_s29 + $0x8] sm:$0xff] %vm2326_vm2, %v4147_v58  ;;  %4800 = vmatmul.mubr.msk.f32.vlgmr.msra.gmra.mxu0 %vm2326_vm2, %v4147_v58  ;;  %s4884_s29 = sshll.u32 %s5013_s0, 4  ;;  %s4885_s29 = int_to_ptr.vmem [resolvable:$false] %s4884_s29 }
 0x998   : > { %s4886_s3 = scalar_lea.vmem %s4885_s29, 512  ;;  %p4887_p0 = scmp.lt.s32.totalorder %s5922_s24, %s4885_s29 }
 0x999   : > { %p4888_p1 = scmp.lt.s32.totalorder %s4886_s3, %s4880_s2 }
 0x99b   : > { %p4889_p2 = por %p4888_p1, %p4887_p0 }
 0x99d   : > { %p4890_p3 = pnand %p4889_p2, %p4883_p13 }
 0x99f   : > { %4893 = shalt.err (!%p4890_p3)
}
 0x9a0   : > { %s4894_s21 = scalar_lea.hbm %s5932_s13, 256  ;;  %s4898_s14 = scalar_lea.hbm %s6043_s10, 512 }
 0x9a1   : > { %p4895_p4 = scmp.ne.s32.totalorder %s5932_s13, %s4894_s21  ;;  %p4899_p9 = scmp.lt.s32.totalorder %s5932_s13, %s6043_s10 }
 0x9a2   : > { %p4900_p10 = scmp.lt.s32.totalorder %s4898_s14, %s4894_s21 }
 0x9a3   : > { %p4896_p7 = pnand %p4895_p4, %p5117_p5 }
 0x9a4   : > { %p4901_p11 = por %p4900_p10, %p4899_p9 }
 0x9a5   : > { %p4897_p8 = pneg %p4896_p7 }
 0x9a7   : > { %p4902_p12 = pnand %p4901_p11, %p4897_p8 }
 0x9a9   : > { %4905 = shalt.err (!%p4902_p12)
}
 0x9aa   : > { %s5014_s3 = smov 128   ;;  %s4264_s29 = scalar_lea.hbm %s6042_s9, %s5926_s30 }
 0x9ab   : > { %4803 = dma.vmem_to_hbm [thread:$0]  (%p5117_p5), %s5922_s24, 256, %s5932_s13, %s5934_s1, %s5014_s3, %s5014_s3, %s6087_s25  }
 0x9ac   : > { %s4266_s21 = sshll.u32 %s5603_s15, 4  ;;  %s6093_s22 = sand.u32 1, %s4988_s18   ;;  %s4267_s21 = int_to_ptr.vmem [resolvable:$true] %s4266_s21 }
 0x9ad   : > { %s4242_s12 = scalar_lea.sflag [#allocation4], %s6093_s22  ;;  %s4906_s14 = scalar_lea.vmem %s4267_s21, 256 }
 0x9ae   : > { %p4907_p13 = scmp.ne.s32.totalorder %s4267_s21, %s4906_s14  ;;  %s5015_s0 = smov [#allocation3]  }
 0x9af   : > { %s4910_s5 = sshll.u32 %s5015_s0, 4  ;;  %s4911_s5 = int_to_ptr.vmem [resolvable:$false] %s4910_s5 }
 0x9b0   : > { %p4908_p0 = pnand %p4907_p13, %p5117_p5  ;;  %s4912_s6 = scalar_lea.vmem %s4911_s5, 512 }
 0x9b1   : > { %p4913_p2 = scmp.lt.s32.totalorder %s4267_s21, %s4911_s5  ;;  %p4914_p3 = scmp.lt.s32.totalorder %s4912_s6, %s4906_s14 }
 0x9b2   : > { %p4909_p1 = pneg %p4908_p0 }
 0x9b3   : > { %p4915_p4 = por %p4914_p3, %p4913_p2 }
 0x9b5   : > { %p4916_p7 = pnand %p4915_p4, %p4909_p1 }
 0x9b7   : > { %4919 = shalt.err (!%p4916_p7)
}
 0x9b8   : > { %s4920_s24 = scalar_lea.hbm %s4264_s29, 256  ;;  %s4924_s4 = scalar_lea.hbm %s6042_s9, 512 }
 0x9b9   : > { %p4921_p8 = scmp.ne.s32.totalorder %s4264_s29, %s4920_s24  ;;  %p4925_p11 = scmp.lt.s32.totalorder %s4264_s29, %s6042_s9 }
 0x9ba   : > { %p4926_p12 = scmp.lt.s32.totalorder %s4924_s4, %s4920_s24 }
 0x9bb   : > { %p4922_p9 = pnand %p4921_p8, %p5117_p5 }
 0x9bc   : > { %p4927_p13 = por %p4926_p12, %p4925_p11 }
 0x9bd   : > { %p4923_p10 = pneg %p4922_p9 }
 0x9bf   : > { %p4928_p0 = pnand %p4927_p13, %p4923_p10 }
 0x9c1   : > { %4931 = shalt.err (!%p4928_p0)
}
 0x9c2   : > { %4802 = dma.vmem_to_hbm [thread:$0]  (%p5117_p5), %s4267_s21, 256, %s4264_s29, %s4242_s12  }
 0x9c3   : > { %s397_s5 = scalar_lea.vmem [#allocation7], %s5600_s16  ;;  %s5987_s24 = scalar_lea.hbm %s6044_s11, %s5926_s30 }
 0x9c4   : > { %s4295_s6 = sshll.u32 %s397_s5, 4  ;;  %s5016_s16 = smov [#allocation7]   ;;  %s5981_s6 = int_to_ptr.vmem [resolvable:$true] %s4295_s6 }
 0x9c5   : > { %s4932_s15 = scalar_lea.vmem %s5981_s6, 256  ;;  %s4936_s29 = sshll.u32 %s5016_s16, 4  ;;  %s4937_s29 = int_to_ptr.vmem [resolvable:$false] %s4936_s29 }
 0x9c6   : > { %p4933_p1 = scmp.ne.s32.totalorder %s5981_s6, %s4932_s15  ;;  %s4938_s21 = scalar_lea.vmem %s4937_s29, 512 }
 0x9c7   : > { %p4939_p4 = scmp.lt.s32.totalorder %s5981_s6, %s4937_s29  ;;  %p4940_p7 = scmp.lt.s32.totalorder %s4938_s21, %s4932_s15 }
 0x9c8   : > { %p4934_p2 = pnand %p4933_p1, %p5117_p5 }
 0x9c9   : > { %p4941_p8 = por %p4940_p7, %p4939_p4 }
 0x9ca   : > { %p4935_p3 = pneg %p4934_p2 }
 0x9cc   : > { %p4942_p9 = pnand %p4941_p8, %p4935_p3 }
 0xa57   : > { %v4801_v17 = vpop.f32.mrf.mxu0 }
 0xa58   : > { %4240 = vst.msk [vmem:[%s397_s5 + $0x8] sm:$0xff] %vm452_vm5, %v4801_v17 }
 0xa59   : > { %v4230_v24 = vpop.f32.mrf.mxu0 }
 0xa5a   : > { %4239 = vst.msk [vmem:[%s397_s5] sm:$0xff] %vm452_vm5, %v4230_v24 }
 0xa5b   : > { %4945 = shalt.err (!%p4942_p9)
}
 0xa5c   : > { %s4946_s30 = scalar_lea.hbm %s5987_s24, 256  ;;  %s4950_s4 = scalar_lea.hbm %s6044_s11, 512 }
 0xa5d   : > { %p4947_p10 = scmp.ne.s32.totalorder %s5987_s24, %s4946_s30  ;;  %p4951_p13 = scmp.lt.s32.totalorder %s5987_s24, %s6044_s11 }
 0xa5e   : > { %p4952_p0 = scmp.lt.s32.totalorder %s4950_s4, %s4946_s30 }
 0xa5f   : > { %p4948_p11 = pnand %p4947_p10, %p5117_p5 }
 0xa60   : > { %p4953_p1 = por %p4952_p0, %p4951_p13 }
 0xa61   : > { %p4949_p12 = pneg %p4948_p11 }
 0xa63   : > { %p4954_p2 = pnand %p4953_p1, %p4949_p12 }
 0xa65   : > { %4957 = shalt.err (!%p4954_p2)
}
 0xa66   : > { %4804 = dma.vmem_to_hbm [thread:$0]  (%p5117_p5), %s5981_s6, 256, %s5987_s24, %s5934_s1, %s5014_s3, %s5014_s3, %s6087_s25  }
 0xa67 PF: > { %p4818_p3 = scmp.ge.s32.totalorder %s4996_s20, 2  ;;  %s4310_s5 = sand.u32 1, %s4984_s17  }
 0xa68   : > { %s4311_s14 = scalar_lea.sflag [#allocation4], %s4310_s5 }
 0xa69   : > { %p4809_p4 = pnand %p4818_p3, %p5121_p6 }
 0xa6b   : > { %p4810_p7 = pneg %p4809_p4 }
 0xa6d   : > { %4975 = dma.done.wait (%p4810_p7), %s4311_s14, 256  }
 0xa6e   : > { %4977 = vsyncadd (%p4810_p7), %s4311_s14, 4294967040  ;;  %s6094_s27 = sadd.s32 4294967294, %s4996_s20  }
 0xa6f   : > { %s4319_s0 = sand.u32 1, %s6094_s27  }
 0xa70   : > { %s4320_s15 = scalar_lea.sflag [#allocation6], %s4319_s0 }
 0xa71   : > { %4979 = dma.done.wait (%p4810_p7), %s4320_s15, 512  }
 0xa72   : > { %4981 = vsyncadd (%p4810_p7), %s4320_s15, 4294966784  ;;  %p25_p5 = scmp.ge.s32.totalorder %s5102_s23, 4   ;;  %s6095_s17 = smov %s4988_s18 }
 0xa73   : > { %s6096_s18 = smov %s4992_s19  ;;  %s6097_s19 = smov %s5115_s26 }
 0xa74   : > { %s6098_s20 = smov %s5102_s23  ;;  %27 = sbr.rel (!%p25_p5) target bundleno = 13 (0xd), region = 156 }
 0xa79   :  { %4334 = vsyncpa [#allocation4], 1 }
 0xa7a   :  { %4336 = vsyncpa [#allocation4 + $0x1], 1 }
 0xa7b   :  { %4337 = vsyncpa [#allocation6], 1 }
 0xa7c   :  { %4339 = vsyncpa [#allocation6 + $0x1], 1 }

</bundles_post_ra>
